<compile_context>
chip_gen: v5e
topology: v5e:2x2
jax: 0.10.0
libtpu: 0.0.40
codegen_flags: <defaults>
</compile_context>

<pallas_src>
import numpy as np

import jax
import jax.numpy as jnp
from jax.experimental import pallas as pl
from jax.experimental.pallas import tpu as pltpu


# ------------------------------ fused kernel --------------------------------

def _make_kernel(B, Cin, H, W):
    """Builds the fused ExpandingBlock kernel for static shapes (B, Cin, H, W)."""
    Cmid = Cin // 2
    Hu, Wu = 2 * H, 2 * W              # upsampled size
    Su = Hu * Wu                       # per-batch frame stride (H1 data rows + 1 pad row)
    H1, W1 = Hu - 1, Wu - 1            # conv1 / conv2 valid output size
    LEAD = pl.cdiv(Wu + 1, 128) * 128  # leading zero lanes (vreg aligned)
    F = LEAD + B * Su                  # frame length in lanes
    N2 = B * Su - Wu - 1               # contiguous conv1/conv2 output span
    N3 = B * Su                        # conv3 output positions (= B*H3*W3)
    NV = B * H1 * W1                   # valid positions for conv2 BatchNorm
    EPS = 1e-5

    offs1 = [p * Wu + q for p in range(2) for q in range(2)]                # k=2 valid
    offs2 = [(p - 1) * Wu + (q - 1) for p in range(3) for q in range(3)]    # k=3 pad=1
    offs3 = [(p - 1) * Wu + (q - 1) for p in range(2) for q in range(2)]    # k=2 pad=1

    def conv_taps(src_ref, base, span, w_ref, offs, cout):
        """sum_t  w_tap[t] (cout,cin) @ src[:, base+off_t : base+off_t+span]."""
        acc = None
        for t, off in enumerate(offs):
            wt = w_ref[t * cout:(t + 1) * cout, :]
            s = base + off
            d = jnp.dot(wt, src_ref[:, s:s + span],
                        preferred_element_type=jnp.float32)
            acc = d if acc is None else acc + d
        return acc

    def bn_relu(y, n, gamma, beta):
        """Training-mode BatchNorm (batch stats, biased var, single pass) + ReLU."""
        mean = jnp.sum(y, axis=1, keepdims=True) / n
        ex2 = jnp.sum(y * y, axis=1, keepdims=True) / n
        var = ex2 - mean * mean
        yn = (y - mean) * jax.lax.rsqrt(var + EPS) * gamma + beta
        return jnp.maximum(yn, 0.0)

    def kernel(x_ref, skip_ref, up_ref, keep_ref, w1_ref, w2_ref, w3_ref,
               pv_ref, out_ref, u_sc, cat_sc, p3_sc):
        b1, b2, b3 = pv_ref[:, 0:1], pv_ref[:, 1:2], pv_ref[:, 2:3]
        gamma, beta = pv_ref[:, 3:4], pv_ref[:, 4:5]
        keep = keep_ref[...]                                    # (1, N2)

        # 1) bilinear x2 upsample: ONE lane-dense MXU matmul, then vreg-aligned
        #    row-group copies into the (Cin, B*Su) frame scratch.
        u_bc = jnp.dot(x_ref[...], up_ref[...],
                       preferred_element_type=jnp.float32)      # (B*Cin, Su)
        for b in range(B):
            u_sc[:, b * Su:(b + 1) * Su] = u_bc[b * Cin:(b + 1) * Cin, :]

        # zero only the frame borders that are never overwritten below
        cat_sc[0:Cmid, 0:LEAD] = jnp.zeros((Cmid, LEAD), jnp.float32)
        cat_sc[0:Cmid, LEAD + N2:F] = jnp.zeros((Cmid, F - LEAD - N2), jnp.float32)
        p3_sc[:, 0:LEAD] = jnp.zeros((Cmid, LEAD), jnp.float32)
        p3_sc[:, LEAD + N2:F] = jnp.zeros((Cmid, F - LEAD - N2), jnp.float32)

        # 2) conv1 (k=2, valid): per-tap matmuls, spatial on lanes
        y1 = (conv_taps(u_sc, 0, N2, w1_ref, offs1, Cmid) + b1) * keep

        # 3) channel-concat [conv1 | cropped skip] straight into the
        #    zero-bordered conv2 frame (rows = channels, lanes = frame)
        cat_sc[0:Cmid, LEAD:LEAD + N2] = y1
        cat_sc[Cmid:2 * Cmid, :] = skip_ref[...]

        # 4) conv2 (k=3, pad=1) + BatchNorm(batch stats) + ReLU
        y2 = (conv_taps(cat_sc, LEAD, N2, w2_ref, offs2, Cmid) + b2) * keep
        y2 = bn_relu(y2, NV, gamma, beta) * keep
        p3_sc[:, LEAD:LEAD + N2] = y2

        # 5) conv3 (k=2, pad=1) + BatchNorm + ReLU (shared gamma/beta)
        y3 = conv_taps(p3_sc, LEAD, N3, w3_ref, offs3, Cmid) + b3
        y3 = bn_relu(y3, N3, gamma, beta)

        # 6) lane-dense output (B*Cmid, H3*W3): NCHW is a free wrapper reshape
        for b in range(B):
            out_ref[b * Cmid:(b + 1) * Cmid, :] = y3[:, b * Su:(b + 1) * Su]

    return kernel


# ------------------------------ glue helpers ---------------------------------

def _bilinear_matrix(n_in, n_out):
    """1-D bilinear resize matrix, align_corners=True (numpy, host-side)."""
    if n_in == 1:
        return np.ones((n_out, 1), np.float32)
    idx = np.arange(n_out, dtype=np.float64) * (n_in - 1) / (n_out - 1)
    lo = np.clip(np.floor(idx).astype(np.int64), 0, n_in - 2)
    frac = (idx - lo).astype(np.float32)
    A = np.zeros((n_out, n_in), np.float32)
    A[np.arange(n_out), lo] += 1.0 - frac
    A[np.arange(n_out), lo + 1] += frac
    return A


def _crop_nchw(image, h, w):
    """Center crop (same arithmetic as the course `crop` helper), NCHW."""
    mh = image.shape[2] // 2
    mw = image.shape[3] // 2
    sh = mh - h // 2
    sw = mw - w // 2
    return image[:, :, sh:sh + h, sw:sw + w]


def crop_nhwc(image, new_shape):
    mh = image.shape[1] // 2
    mw = image.shape[2] // 2
    sh = mh - new_shape[1] // 2
    sw = mw - new_shape[2] // 2
    return image[:, sh:sh + new_shape[1], sw:sw + new_shape[2], :]


def init_params(key, input_channels):
    c_in, c_out = input_channels, input_channels // 2
    ks = jax.random.split(key, 6)

    def conv_init(kw_, kb_, kh, kwd, cin, cout):
        fan_in = cin * kh * kwd
        bound = 1.0 / np.sqrt(fan_in)
        w = jax.random.uniform(kw_, (kh, kwd, cin, cout), jnp.float32,
                               -bound, bound)
        b = jax.random.uniform(kb_, (cout,), jnp.float32, -bound, bound)
        return w, b

    w1, b1 = conv_init(ks[0], ks[1], 2, 2, c_in, c_out)
    w2, b2 = conv_init(ks[2], ks[3], 3, 3, c_in, c_out)
    w3, b3 = conv_init(ks[4], ks[5], 2, 2, c_out, c_out)
    gamma = jnp.ones((c_out,), jnp.float32)    # BatchNorm2d default init
    beta = jnp.zeros((c_out,), jnp.float32)
    return dict(w1=w1, b1=b1, w2=w2, b2=b2, w3=w3, b3=b3,
                gamma=gamma, beta=beta)


# ---------------------------- forward (Pallas) --------------------------------

def expanding_block_forward(x_nchw, skip_nchw, params):
    B, Cin, H, W = x_nchw.shape
    Cmid = Cin // 2
    Hu, Wu = 2 * H, 2 * W
    Su = Hu * Wu
    H1, W1 = Hu - 1, Wu - 1
    H3, W3 = Hu, Wu
    LEAD = pl.cdiv(Wu + 1, 128) * 128
    F = LEAD + B * Su
    N2 = B * Su - Wu - 1

    # host-side constants ------------------------------------------------------
    up_matT = jnp.asarray(
        np.kron(_bilinear_matrix(H, Hu), _bilinear_matrix(W, Wu)).T)   # (H*W, Su)
    rel = np.arange(N2)
    pad_pos = ((rel % Wu) == Wu - 1) | ((rel % Su) >= H1 * Wu)
    keep = jnp.asarray((~pad_pos).astype(np.float32)[None, :])         # (1, N2)

    # input-side glue (raw inputs / params only); all block intermediates stay
    # inside the single pallas_call below.
    x2d = x_nchw.reshape(B * Cin, H * W)                               # free reshape
    skip_c = _crop_nchw(skip_nchw, H1, W1)                             # (B,Cmid,H1,W1)
    skip_p = jnp.pad(skip_c, ((0, 0), (0, 0), (0, 1), (0, 1)))         # (B,Cmid,Hu,Wu)
    skip_frame = jnp.concatenate(
        [jnp.zeros((Cmid, LEAD), jnp.float32),
         jnp.transpose(skip_p, (1, 0, 2, 3)).reshape(Cmid, B * Su)], axis=1)

    def taps(w):   # HWIO (kh,kw,ci,co) -> per-tap transposed (kh*kw*co, ci)
        kh, kw, ci, co = w.shape
        return jnp.transpose(w, (0, 1, 3, 2)).reshape(kh * kw * co, ci)

    pvec = jnp.stack([params["b1"], params["b2"], params["b3"],
                      params["gamma"], params["beta"]], axis=1)        # (Cmid, 5)

    out2d = pl.pallas_call(
        _make_kernel(B, Cin, H, W),
        out_shape=jax.ShapeDtypeStruct((B * Cmid, H3 * W3), jnp.float32),
        scratch_shapes=[
            pltpu.VMEM((Cin, B * Su), jnp.float32),      # upsampled frame
            pltpu.VMEM((2 * Cmid, F), jnp.float32),      # conv2 input frame (concat)
            pltpu.VMEM((Cmid, F), jnp.float32),          # conv3 input frame
        ],
    )(x2d, skip_frame, up_matT, keep,
      taps(params["w1"]), taps(params["w2"]), taps(params["w3"]), pvec)

    return out2d.reshape(B, Cmid, H3, W3)                # free reshape, no transpose


# --------------------------- plain-JAX reference ------------------------------

def _conv_ref(x, w, b):
    y = jax.lax.conv_general_dilated(
        x, w, (1, 1), "VALID",
        dimension_numbers=("NHWC", "HWIO", "NHWC"),
        precision=jax.lax.Precision.HIGHEST)
    return y + b


def _bn_relu_ref(x, gamma, beta):
    mean = jnp.mean(x, axis=(0, 1, 2), keepdims=True)
    var = jnp.mean((x - mean) ** 2, axis=(0, 1, 2), keepdims=True)
    y = (x - mean) * jax.lax.rsqrt(var + 1e-5) * gamma + beta
    return jnp.maximum(y, 0.0)


def expanding_block_ref(x_nchw, skip_nchw, params):
    x = jnp.transpose(x_nchw, (0, 2, 3, 1))
    skip = jnp.transpose(skip_nchw, (0, 2, 3, 1))
    B, H, W, C = x.shape
    Ah = jnp.asarray(_bilinear_matrix(H, 2 * H))
    Aw = jnp.asarray(_bilinear_matrix(W, 2 * W))
    t = jnp.einsum("ip,bpwc->biwc", Ah, x, precision="highest")
    x = jnp.einsum("jq,biqc->bijc", Aw, t, precision="highest")
    x = _conv_ref(x, params["w1"], params["b1"])
    x = jnp.concatenate([x, crop_nhwc(skip, x.shape)], axis=-1)
    x = _conv_ref(jnp.pad(x, ((0, 0), (1, 1), (1, 1), (0, 0))),
                  params["w2"], params["b2"])
    x = _bn_relu_ref(x, params["gamma"], params["beta"])
    x = _conv_ref(jnp.pad(x, ((0, 0), (1, 1), (1, 1), (0, 0))),
                  params["w3"], params["b3"])
    x = _bn_relu_ref(x, params["gamma"], params["beta"])
    return jnp.transpose(x, (0, 3, 1, 2))


# ---------------------------------- main --------------------------------------

if __name__ == "__main__":
    key = jax.random.PRNGKey(0)
    k_x, k_skip, k_p = jax.random.split(key, 3)

    B, C_IN, H, W = 2, 8, 8, 8          # input_channels = 8
    # skip connection tensor from the contracting path: C_IN//2 channels,
    # larger spatial extent (gets center-cropped to 15x15).
    x = jax.random.normal(k_x, (B, C_IN, H, W), jnp.float32)
    skip_con_x = jax.random.normal(k_skip, (B, C_IN // 2, 18, 18), jnp.float32)

    params = init_params(k_p, C_IN)

    fwd = jax.jit(expanding_block_forward)
    out = jax.block_until_ready(fwd(x, skip_con_x, params))
    assert out.shape == (B, C_IN // 2, 16, 16), out.shape

    ref = jax.block_until_ready(expanding_block_ref(x, skip_con_x, params))
    np.testing.assert_allclose(np.asarray(out), np.asarray(ref),
                               rtol=1e-3, atol=1e-3)

    print("KERNEL_OK")
</pallas_src>

<mosaic_0001>
module attributes {stable_mosaic.version = 11 : i64} {
  func.func @kernel(%arg0: memref<16x64xf32, #tpu.memory_space<vmem>>, %arg1: memref<4x640xf32, #tpu.memory_space<vmem>>, %arg2: memref<64x256xf32, #tpu.memory_space<vmem>>, %arg3: memref<1x495xf32, #tpu.memory_space<vmem>>, %arg4: memref<16x8xf32, #tpu.memory_space<vmem>>, %arg5: memref<36x8xf32, #tpu.memory_space<vmem>>, %arg6: memref<16x4xf32, #tpu.memory_space<vmem>>, %arg7: memref<4x5xf32, #tpu.memory_space<vmem>>, %arg8: memref<8x256xf32, #tpu.memory_space<vmem>>, %arg9: memref<8x512xf32, #tpu.memory_space<vmem>>, %arg10: memref<8x640xf32, #tpu.memory_space<vmem>>, %arg11: memref<4x640xf32, #tpu.memory_space<vmem>>) attributes {dimension_semantics = [], scalar_prefetch = 0 : i64, scratch_operands = 3 : i64, tpu.core_type = #tpu.core_type<tc>} {
    %c0 = arith.constant 0 : index
    %c0_0 = arith.constant 0 : index
    %0 = vector.load %arg7[%c0, %c0_0] : memref<4x5xf32, #tpu.memory_space<vmem>>, vector<4x1xf32>
    %c0_1 = arith.constant 0 : index
    %c1 = arith.constant 1 : index
    %1 = vector.load %arg7[%c0_1, %c1] : memref<4x5xf32, #tpu.memory_space<vmem>>, vector<4x1xf32>
    %c0_2 = arith.constant 0 : index
    %c2 = arith.constant 2 : index
    %2 = vector.load %arg7[%c0_2, %c2] : memref<4x5xf32, #tpu.memory_space<vmem>>, vector<4x1xf32>
    %c0_3 = arith.constant 0 : index
    %c3 = arith.constant 3 : index
    %3 = vector.load %arg7[%c0_3, %c3] : memref<4x5xf32, #tpu.memory_space<vmem>>, vector<4x1xf32>
    %c0_4 = arith.constant 0 : index
    %c4 = arith.constant 4 : index
    %4 = vector.load %arg7[%c0_4, %c4] : memref<4x5xf32, #tpu.memory_space<vmem>>, vector<4x1xf32>
    %c0_5 = arith.constant 0 : index
    %c0_6 = arith.constant 0 : index
    %5 = vector.load %arg3[%c0_5, %c0_6] : memref<1x495xf32, #tpu.memory_space<vmem>>, vector<1x495xf32>
    %c0_7 = arith.constant 0 : index
    %c0_8 = arith.constant 0 : index
    %6 = vector.load %arg0[%c0_7, %c0_8] : memref<16x64xf32, #tpu.memory_space<vmem>>, vector<16x64xf32>
    %c0_9 = arith.constant 0 : index
    %c0_10 = arith.constant 0 : index
    %7 = vector.load %arg2[%c0_9, %c0_10] : memref<64x256xf32, #tpu.memory_space<vmem>>, vector<64x256xf32>
    %cst = arith.constant dense<0.000000e+00> : vector<16x256xf32>
    %8 = tpu.matmul %6, %7, %cst {dimension_numbers = #tpu.dot_dimension_numbers<[1], [0], [0], [1], [0, 0, 1, 1], [], []>} : vector<16x64xf32>, vector<64x256xf32>, vector<16x256xf32> -> vector<16x256xf32>
    %9 = vector.extract_strided_slice %8 {offsets = [0, 0], sizes = [8, 256], strides = [1, 1]} : vector<16x256xf32> to vector<8x256xf32>
    %c0_11 = arith.constant 0 : index
    %c0_12 = arith.constant 0 : index
    %10 = vector.load %arg9[%c0_11, %c0_12] : memref<8x512xf32, #tpu.memory_space<vmem>>, vector<8x256xf32>
    tpu.vector_store %arg9[%c0_11, %c0_12], %9 {strides = array<i32>} : memref<8x512xf32, #tpu.memory_space<vmem>>, vector<8x256xf32>,
    %11 = vector.extract_strided_slice %8 {offsets = [8, 0], sizes = [8, 256], strides = [1, 1]} : vector<16x256xf32> to vector<8x256xf32>
    %c0_13 = arith.constant 0 : index
    %c256 = arith.constant 256 : index
    %12 = vector.load %arg9[%c0_13, %c256] : memref<8x512xf32, #tpu.memory_space<vmem>>, vector<8x256xf32>
    tpu.vector_store %arg9[%c0_13, %c256], %11 {strides = array<i32>} : memref<8x512xf32, #tpu.memory_space<vmem>>, vector<8x256xf32>,
    %cst_14 = arith.constant 0.000000e+00 : f32
    %13 = vector.broadcast %cst_14 : f32 to vector<4x128xf32>
    %c0_15 = arith.constant 0 : index
    %c0_16 = arith.constant 0 : index
    %14 = vector.load %arg10[%c0_15, %c0_16] : memref<8x640xf32, #tpu.memory_space<vmem>>, vector<4x128xf32>
    tpu.vector_store %arg10[%c0_15, %c0_16], %13 {strides = array<i32>} : memref<8x640xf32, #tpu.memory_space<vmem>>, vector<4x128xf32>,
    %cst_17 = arith.constant 0.000000e+00 : f32
    %15 = vector.broadcast %cst_17 : f32 to vector<4x17xf32>
    %c0_18 = arith.constant 0 : index
    %c623 = arith.constant 623 : index
    %16 = vector.load %arg10[%c0_18, %c623] : memref<8x640xf32, #tpu.memory_space<vmem>>, vector<4x17xf32>
    tpu.vector_store %arg10[%c0_18, %c623], %15 {strides = array<i32>} : memref<8x640xf32, #tpu.memory_space<vmem>>, vector<4x17xf32>,
    %cst_19 = arith.constant 0.000000e+00 : f32
    %17 = vector.broadcast %cst_19 : f32 to vector<4x128xf32>
    %c0_20 = arith.constant 0 : index
    %c0_21 = arith.constant 0 : index
    %18 = vector.load %arg11[%c0_20, %c0_21] : memref<4x640xf32, #tpu.memory_space<vmem>>, vector<4x128xf32>
    tpu.vector_store %arg11[%c0_20, %c0_21], %17 {strides = array<i32>} : memref<4x640xf32, #tpu.memory_space<vmem>>, vector<4x128xf32>,
    %cst_22 = arith.constant 0.000000e+00 : f32
    %19 = vector.broadcast %cst_22 : f32 to vector<4x17xf32>
    %c0_23 = arith.constant 0 : index
    %c623_24 = arith.constant 623 : index
    %20 = vector.load %arg11[%c0_23, %c623_24] : memref<4x640xf32, #tpu.memory_space<vmem>>, vector<4x17xf32>
    tpu.vector_store %arg11[%c0_23, %c623_24], %19 {strides = array<i32>} : memref<4x640xf32, #tpu.memory_space<vmem>>, vector<4x17xf32>,
    %c0_25 = arith.constant 0 : index
    %c0_26 = arith.constant 0 : index
    %21 = vector.load %arg4[%c0_25, %c0_26] : memref<16x8xf32, #tpu.memory_space<vmem>>, vector<4x8xf32>
    %c0_27 = arith.constant 0 : index
    %c0_28 = arith.constant 0 : index
    %22 = vector.load %arg9[%c0_27, %c0_28] : memref<8x512xf32, #tpu.memory_space<vmem>>, vector<8x495xf32>
    %cst_29 = arith.constant dense<0.000000e+00> : vector<4x495xf32>
    %23 = tpu.matmul %21, %22, %cst_29 {dimension_numbers = #tpu.dot_dimension_numbers<[1], [0], [0], [1], [0, 0, 1, 1], [], []>} : vector<4x8xf32>, vector<8x495xf32>, vector<4x495xf32> -> vector<4x495xf32>
    %c4_30 = arith.constant 4 : index
    %c0_31 = arith.constant 0 : index
    %24 = vector.load %arg4[%c4_30, %c0_31] : memref<16x8xf32, #tpu.memory_space<vmem>>, vector<4x8xf32>
    %c0_32 = arith.constant 0 : index
    %c1_33 = arith.constant 1 : index
    %25 = vector.load %arg9[%c0_32, %c1_33] : memref<8x512xf32, #tpu.memory_space<vmem>>, vector<8x495xf32>
    %cst_34 = arith.constant dense<0.000000e+00> : vector<4x495xf32>
    %26 = tpu.matmul %24, %25, %cst_34 {dimension_numbers = #tpu.dot_dimension_numbers<[1], [0], [0], [1], [0, 0, 1, 1], [], []>} : vector<4x8xf32>, vector<8x495xf32>, vector<4x495xf32> -> vector<4x495xf32>
    %27 = arith.addf %23, %26 : vector<4x495xf32>
    %c8 = arith.constant 8 : index
    %c0_35 = arith.constant 0 : index
    %28 = vector.load %arg4[%c8, %c0_35] : memref<16x8xf32, #tpu.memory_space<vmem>>, vector<4x8xf32>
    %c0_36 = arith.constant 0 : index
    %c16 = arith.constant 16 : index
    %29 = vector.load %arg9[%c0_36, %c16] : memref<8x512xf32, #tpu.memory_space<vmem>>, vector<8x495xf32>
    %cst_37 = arith.constant dense<0.000000e+00> : vector<4x495xf32>
    %30 = tpu.matmul %28, %29, %cst_37 {dimension_numbers = #tpu.dot_dimension_numbers<[1], [0], [0], [1], [0, 0, 1, 1], [], []>} : vector<4x8xf32>, vector<8x495xf32>, vector<4x495xf32> -> vector<4x495xf32>
    %31 = arith.addf %27, %30 : vector<4x495xf32>
    %c12 = arith.constant 12 : index
    %c0_38 = arith.constant 0 : index
    %32 = vector.load %arg4[%c12, %c0_38] : memref<16x8xf32, #tpu.memory_space<vmem>>, vector<4x8xf32>
    %c0_39 = arith.constant 0 : index
    %c17 = arith.constant 17 : index
    %33 = vector.load %arg9[%c0_39, %c17] : memref<8x512xf32, #tpu.memory_space<vmem>>, vector<8x495xf32>
    %cst_40 = arith.constant dense<0.000000e+00> : vector<4x495xf32>
    %34 = tpu.matmul %32, %33, %cst_40 {dimension_numbers = #tpu.dot_dimension_numbers<[1], [0], [0], [1], [0, 0, 1, 1], [], []>} : vector<4x8xf32>, vector<8x495xf32>, vector<4x495xf32> -> vector<4x495xf32>
    %35 = arith.addf %31, %34 : vector<4x495xf32>
    %36 = vector.broadcast %0 : vector<4x1xf32> to vector<4x495xf32>
    %37 = arith.addf %35, %36 : vector<4x495xf32>
    %38 = vector.broadcast %5 : vector<1x495xf32> to vector<4x495xf32>
    %39 = arith.mulf %37, %38 : vector<4x495xf32>
    %c0_41 = arith.constant 0 : index
    %c128 = arith.constant 128 : index
    %40 = vector.load %arg10[%c0_41, %c128] : memref<8x640xf32, #tpu.memory_space<vmem>>, vector<4x495xf32>
    tpu.vector_store %arg10[%c0_41, %c128], %39 {strides = array<i32>} : memref<8x640xf32, #tpu.memory_space<vmem>>, vector<4x495xf32>,
    %c0_42 = arith.constant 0 : index
    %c0_43 = arith.constant 0 : index
    %41 = vector.load %arg1[%c0_42, %c0_43] : memref<4x640xf32, #tpu.memory_space<vmem>>, vector<4x640xf32>
    %c4_44 = arith.constant 4 : index
    %c0_45 = arith.constant 0 : index
    %42 = vector.load %arg10[%c4_44, %c0_45] : memref<8x640xf32, #tpu.memory_space<vmem>>, vector<4x640xf32>
    tpu.vector_store %arg10[%c4_44, %c0_45], %41 {strides = array<i32>} : memref<8x640xf32, #tpu.memory_space<vmem>>, vector<4x640xf32>,
    %c0_46 = arith.constant 0 : index
    %c0_47 = arith.constant 0 : index
    %43 = vector.load %arg5[%c0_46, %c0_47] : memref<36x8xf32, #tpu.memory_space<vmem>>, vector<4x8xf32>
    %c0_48 = arith.constant 0 : index
    %c111 = arith.constant 111 : index
    %44 = vector.load %arg10[%c0_48, %c111] : memref<8x640xf32, #tpu.memory_space<vmem>>, vector<8x495xf32>
    %cst_49 = arith.constant dense<0.000000e+00> : vector<4x495xf32>
    %45 = tpu.matmul %43, %44, %cst_49 {dimension_numbers = #tpu.dot_dimension_numbers<[1], [0], [0], [1], [0, 0, 1, 1], [], []>} : vector<4x8xf32>, vector<8x495xf32>, vector<4x495xf32> -> vector<4x495xf32>
    %c4_50 = arith.constant 4 : index
    %c0_51 = arith.constant 0 : index
    %46 = vector.load %arg5[%c4_50, %c0_51] : memref<36x8xf32, #tpu.memory_space<vmem>>, vector<4x8xf32>
    %c0_52 = arith.constant 0 : index
    %c112 = arith.constant 112 : index
    %47 = vector.load %arg10[%c0_52, %c112] : memref<8x640xf32, #tpu.memory_space<vmem>>, vector<8x495xf32>
    %cst_53 = arith.constant dense<0.000000e+00> : vector<4x495xf32>
    %48 = tpu.matmul %46, %47, %cst_53 {dimension_numbers = #tpu.dot_dimension_numbers<[1], [0], [0], [1], [0, 0, 1, 1], [], []>} : vector<4x8xf32>, vector<8x495xf32>, vector<4x495xf32> -> vector<4x495xf32>
    %49 = arith.addf %45, %48 : vector<4x495xf32>
    %c8_54 = arith.constant 8 : index
    %c0_55 = arith.constant 0 : index
    %50 = vector.load %arg5[%c8_54, %c0_55] : memref<36x8xf32, #tpu.memory_space<vmem>>, vector<4x8xf32>
    %c0_56 = arith.constant 0 : index
    %c113 = arith.constant 113 : index
    %51 = vector.load %arg10[%c0_56, %c113] : memref<8x640xf32, #tpu.memory_space<vmem>>, vector<8x495xf32>
    %cst_57 = arith.constant dense<0.000000e+00> : vector<4x495xf32>
    %52 = tpu.matmul %50, %51, %cst_57 {dimension_numbers = #tpu.dot_dimension_numbers<[1], [0], [0], [1], [0, 0, 1, 1], [], []>} : vector<4x8xf32>, vector<8x495xf32>, vector<4x495xf32> -> vector<4x495xf32>
    %53 = arith.addf %49, %52 : vector<4x495xf32>
    %c12_58 = arith.constant 12 : index
    %c0_59 = arith.constant 0 : index
    %54 = vector.load %arg5[%c12_58, %c0_59] : memref<36x8xf32, #tpu.memory_space<vmem>>, vector<4x8xf32>
    %c0_60 = arith.constant 0 : index
    %c127 = arith.constant 127 : index
    %55 = vector.load %arg10[%c0_60, %c127] : memref<8x640xf32, #tpu.memory_space<vmem>>, vector<8x495xf32>
    %cst_61 = arith.constant dense<0.000000e+00> : vector<4x495xf32>
    %56 = tpu.matmul %54, %55, %cst_61 {dimension_numbers = #tpu.dot_dimension_numbers<[1], [0], [0], [1], [0, 0, 1, 1], [], []>} : vector<4x8xf32>, vector<8x495xf32>, vector<4x495xf32> -> vector<4x495xf32>
    %57 = arith.addf %53, %56 : vector<4x495xf32>
    %c16_62 = arith.constant 16 : index
    %c0_63 = arith.constant 0 : index
    %58 = vector.load %arg5[%c16_62, %c0_63] : memref<36x8xf32, #tpu.memory_space<vmem>>, vector<4x8xf32>
    %c0_64 = arith.constant 0 : index
    %c128_65 = arith.constant 128 : index
    %59 = vector.load %arg10[%c0_64, %c128_65] : memref<8x640xf32, #tpu.memory_space<vmem>>, vector<8x495xf32>
    %cst_66 = arith.constant dense<0.000000e+00> : vector<4x495xf32>
    %60 = tpu.matmul %58, %59, %cst_66 {dimension_numbers = #tpu.dot_dimension_numbers<[1], [0], [0], [1], [0, 0, 1, 1], [], []>} : vector<4x8xf32>, vector<8x495xf32>, vector<4x495xf32> -> vector<4x495xf32>
    %61 = arith.addf %57, %60 : vector<4x495xf32>
    %c20 = arith.constant 20 : index
    %c0_67 = arith.constant 0 : index
    %62 = vector.load %arg5[%c20, %c0_67] : memref<36x8xf32, #tpu.memory_space<vmem>>, vector<4x8xf32>
    %c0_68 = arith.constant 0 : index
    %c129 = arith.constant 129 : index
    %63 = vector.load %arg10[%c0_68, %c129] : memref<8x640xf32, #tpu.memory_space<vmem>>, vector<8x495xf32>
    %cst_69 = arith.constant dense<0.000000e+00> : vector<4x495xf32>
    %64 = tpu.matmul %62, %63, %cst_69 {dimension_numbers = #tpu.dot_dimension_numbers<[1], [0], [0], [1], [0, 0, 1, 1], [], []>} : vector<4x8xf32>, vector<8x495xf32>, vector<4x495xf32> -> vector<4x495xf32>
    %65 = arith.addf %61, %64 : vector<4x495xf32>
    %c24 = arith.constant 24 : index
    %c0_70 = arith.constant 0 : index
    %66 = vector.load %arg5[%c24, %c0_70] : memref<36x8xf32, #tpu.memory_space<vmem>>, vector<4x8xf32>
    %c0_71 = arith.constant 0 : index
    %c143 = arith.constant 143 : index
    %67 = vector.load %arg10[%c0_71, %c143] : memref<8x640xf32, #tpu.memory_space<vmem>>, vector<8x495xf32>
    %cst_72 = arith.constant dense<0.000000e+00> : vector<4x495xf32>
    %68 = tpu.matmul %66, %67, %cst_72 {dimension_numbers = #tpu.dot_dimension_numbers<[1], [0], [0], [1], [0, 0, 1, 1], [], []>} : vector<4x8xf32>, vector<8x495xf32>, vector<4x495xf32> -> vector<4x495xf32>
    %69 = arith.addf %65, %68 : vector<4x495xf32>
    %c28 = arith.constant 28 : index
    %c0_73 = arith.constant 0 : index
    %70 = vector.load %arg5[%c28, %c0_73] : memref<36x8xf32, #tpu.memory_space<vmem>>, vector<4x8xf32>
    %c0_74 = arith.constant 0 : index
    %c144 = arith.constant 144 : index
    %71 = vector.load %arg10[%c0_74, %c144] : memref<8x640xf32, #tpu.memory_space<vmem>>, vector<8x495xf32>
    %cst_75 = arith.constant dense<0.000000e+00> : vector<4x495xf32>
    %72 = tpu.matmul %70, %71, %cst_75 {dimension_numbers = #tpu.dot_dimension_numbers<[1], [0], [0], [1], [0, 0, 1, 1], [], []>} : vector<4x8xf32>, vector<8x495xf32>, vector<4x495xf32> -> vector<4x495xf32>
    %73 = arith.addf %69, %72 : vector<4x495xf32>
    %c32 = arith.constant 32 : index
    %c0_76 = arith.constant 0 : index
    %74 = vector.load %arg5[%c32, %c0_76] : memref<36x8xf32, #tpu.memory_space<vmem>>, vector<4x8xf32>
    %c0_77 = arith.constant 0 : index
    %c145 = arith.constant 145 : index
    %75 = vector.load %arg10[%c0_77, %c145] : memref<8x640xf32, #tpu.memory_space<vmem>>, vector<8x495xf32>
    %cst_78 = arith.constant dense<0.000000e+00> : vector<4x495xf32>
    %76 = tpu.matmul %74, %75, %cst_78 {dimension_numbers = #tpu.dot_dimension_numbers<[1], [0], [0], [1], [0, 0, 1, 1], [], []>} : vector<4x8xf32>, vector<8x495xf32>, vector<4x495xf32> -> vector<4x495xf32>
    %77 = arith.addf %73, %76 : vector<4x495xf32>
    %78 = vector.broadcast %1 : vector<4x1xf32> to vector<4x495xf32>
    %79 = arith.addf %77, %78 : vector<4x495xf32>
    %80 = vector.broadcast %5 : vector<1x495xf32> to vector<4x495xf32>
    %81 = arith.mulf %79, %80 : vector<4x495xf32>
    %cst_79 = arith.constant dense<0.000000e+00> : vector<4xf32>
    %82 = vector.multi_reduction <add>, %81, %cst_79 [1] : vector<4x495xf32> to vector<4xf32>
    %83 = vector.shape_cast %82 : vector<4xf32> to vector<4x1xf32>
    %cst_80 = arith.constant 4.500000e+02 : f32
    %84 = vector.broadcast %cst_80 : f32 to vector<4x1xf32>
    %85 = arith.divf %83, %84 : vector<4x1xf32>
    %86 = arith.mulf %81, %81 : vector<4x495xf32>
    %cst_81 = arith.constant dense<0.000000e+00> : vector<4xf32>
    %87 = vector.multi_reduction <add>, %86, %cst_81 [1] : vector<4x495xf32> to vector<4xf32>
    %88 = vector.shape_cast %87 : vector<4xf32> to vector<4x1xf32>
    %cst_82 = arith.constant 4.500000e+02 : f32
    %89 = vector.broadcast %cst_82 : f32 to vector<4x1xf32>
    %90 = arith.divf %88, %89 : vector<4x1xf32>
    %91 = arith.mulf %85, %85 : vector<4x1xf32>
    %92 = arith.subf %90, %91 : vector<4x1xf32>
    %93 = vector.broadcast %85 : vector<4x1xf32> to vector<4x495xf32>
    %94 = arith.subf %81, %93 : vector<4x495xf32>
    %cst_83 = arith.constant 9.99999974E-6 : f32
    %95 = vector.broadcast %cst_83 : f32 to vector<4x1xf32>
    %96 = arith.addf %92, %95 : vector<4x1xf32>
    %97 = math.rsqrt %96 : vector<4x1xf32>
    %98 = vector.broadcast %97 : vector<4x1xf32> to vector<4x495xf32>
    %99 = arith.mulf %94, %98 : vector<4x495xf32>
    %100 = vector.broadcast %3 : vector<4x1xf32> to vector<4x495xf32>
    %101 = arith.mulf %99, %100 : vector<4x495xf32>
    %102 = vector.broadcast %4 : vector<4x1xf32> to vector<4x495xf32>
    %103 = arith.addf %101, %102 : vector<4x495xf32>
    %cst_84 = arith.constant 0.000000e+00 : f32
    %104 = vector.broadcast %cst_84 : f32 to vector<4x495xf32>
    %105 = arith.maximumf %103, %104 : vector<4x495xf32>
    %106 = vector.broadcast %5 : vector<1x495xf32> to vector<4x495xf32>
    %107 = arith.mulf %105, %106 : vector<4x495xf32>
    %c0_85 = arith.constant 0 : index
    %c128_86 = arith.constant 128 : index
    %108 = vector.load %arg11[%c0_85, %c128_86] : memref<4x640xf32, #tpu.memory_space<vmem>>, vector<4x495xf32>
    tpu.vector_store %arg11[%c0_85, %c128_86], %107 {strides = array<i32>} : memref<4x640xf32, #tpu.memory_space<vmem>>, vector<4x495xf32>,
    %c0_87 = arith.constant 0 : index
    %c0_88 = arith.constant 0 : index
    %109 = vector.load %arg6[%c0_87, %c0_88] : memref<16x4xf32, #tpu.memory_space<vmem>>, vector<4x4xf32>
    %c0_89 = arith.constant 0 : index
    %c111_90 = arith.constant 111 : index
    %110 = vector.load %arg11[%c0_89, %c111_90] : memref<4x640xf32, #tpu.memory_space<vmem>>, vector<4x512xf32>
    %cst_91 = arith.constant dense<0.000000e+00> : vector<4x512xf32>
    %111 = tpu.matmul %109, %110, %cst_91 {dimension_numbers = #tpu.dot_dimension_numbers<[1], [0], [0], [1], [0, 0, 1, 1], [], []>} : vector<4x4xf32>, vector<4x512xf32>, vector<4x512xf32> -> vector<4x512xf32>
    %c4_92 = arith.constant 4 : index
    %c0_93 = arith.constant 0 : index
    %112 = vector.load %arg6[%c4_92, %c0_93] : memref<16x4xf32, #tpu.memory_space<vmem>>, vector<4x4xf32>
    %c0_94 = arith.constant 0 : index
    %c112_95 = arith.constant 112 : index
    %113 = vector.load %arg11[%c0_94, %c112_95] : memref<4x640xf32, #tpu.memory_space<vmem>>, vector<4x512xf32>
    %cst_96 = arith.constant dense<0.000000e+00> : vector<4x512xf32>
    %114 = tpu.matmul %112, %113, %cst_96 {dimension_numbers = #tpu.dot_dimension_numbers<[1], [0], [0], [1], [0, 0, 1, 1], [], []>} : vector<4x4xf32>, vector<4x512xf32>, vector<4x512xf32> -> vector<4x512xf32>
    %115 = arith.addf %111, %114 : vector<4x512xf32>
    %c8_97 = arith.constant 8 : index
    %c0_98 = arith.constant 0 : index
    %116 = vector.load %arg6[%c8_97, %c0_98] : memref<16x4xf32, #tpu.memory_space<vmem>>, vector<4x4xf32>
    %c0_99 = arith.constant 0 : index
    %c127_100 = arith.constant 127 : index
    %117 = vector.load %arg11[%c0_99, %c127_100] : memref<4x640xf32, #tpu.memory_space<vmem>>, vector<4x512xf32>
    %cst_101 = arith.constant dense<0.000000e+00> : vector<4x512xf32>
    %118 = tpu.matmul %116, %117, %cst_101 {dimension_numbers = #tpu.dot_dimension_numbers<[1], [0], [0], [1], [0, 0, 1, 1], [], []>} : vector<4x4xf32>, vector<4x512xf32>, vector<4x512xf32> -> vector<4x512xf32>
    %119 = arith.addf %115, %118 : vector<4x512xf32>
    %c12_102 = arith.constant 12 : index
    %c0_103 = arith.constant 0 : index
    %120 = vector.load %arg6[%c12_102, %c0_103] : memref<16x4xf32, #tpu.memory_space<vmem>>, vector<4x4xf32>
    %c0_104 = arith.constant 0 : index
    %c128_105 = arith.constant 128 : index
    %121 = vector.load %arg11[%c0_104, %c128_105] : memref<4x640xf32, #tpu.memory_space<vmem>>, vector<4x512xf32>
    %cst_106 = arith.constant dense<0.000000e+00> : vector<4x512xf32>
    %122 = tpu.matmul %120, %121, %cst_106 {dimension_numbers = #tpu.dot_dimension_numbers<[1], [0], [0], [1], [0, 0, 1, 1], [], []>} : vector<4x4xf32>, vector<4x512xf32>, vector<4x512xf32> -> vector<4x512xf32>
    %123 = arith.addf %119, %122 : vector<4x512xf32>
    %124 = vector.broadcast %2 : vector<4x1xf32> to vector<4x512xf32>
    %125 = arith.addf %123, %124 : vector<4x512xf32>
    %cst_107 = arith.constant dense<0.000000e+00> : vector<4xf32>
    %126 = vector.multi_reduction <add>, %125, %cst_107 [1] : vector<4x512xf32> to vector<4xf32>
    %127 = vector.shape_cast %126 : vector<4xf32> to vector<4x1xf32>
    %cst_108 = arith.constant 5.120000e+02 : f32
    %128 = vector.broadcast %cst_108 : f32 to vector<4x1xf32>
    %129 = arith.divf %127, %128 : vector<4x1xf32>
    %130 = arith.mulf %125, %125 : vector<4x512xf32>
    %cst_109 = arith.constant dense<0.000000e+00> : vector<4xf32>
    %131 = vector.multi_reduction <add>, %130, %cst_109 [1] : vector<4x512xf32> to vector<4xf32>
    %132 = vector.shape_cast %131 : vector<4xf32> to vector<4x1xf32>
    %cst_110 = arith.constant 5.120000e+02 : f32
    %133 = vector.broadcast %cst_110 : f32 to vector<4x1xf32>
    %134 = arith.divf %132, %133 : vector<4x1xf32>
    %135 = arith.mulf %129, %129 : vector<4x1xf32>
    %136 = arith.subf %134, %135 : vector<4x1xf32>
    %137 = vector.broadcast %129 : vector<4x1xf32> to vector<4x512xf32>
    %138 = arith.subf %125, %137 : vector<4x512xf32>
    %cst_111 = arith.constant 9.99999974E-6 : f32
    %139 = vector.broadcast %cst_111 : f32 to vector<4x1xf32>
    %140 = arith.addf %136, %139 : vector<4x1xf32>
    %141 = math.rsqrt %140 : vector<4x1xf32>
    %142 = vector.broadcast %141 : vector<4x1xf32> to vector<4x512xf32>
    %143 = arith.mulf %138, %142 : vector<4x512xf32>
    %144 = vector.broadcast %3 : vector<4x1xf32> to vector<4x512xf32>
    %145 = arith.mulf %143, %144 : vector<4x512xf32>
    %146 = vector.broadcast %4 : vector<4x1xf32> to vector<4x512xf32>
    %147 = arith.addf %145, %146 : vector<4x512xf32>
    %cst_112 = arith.constant 0.000000e+00 : f32
    %148 = vector.broadcast %cst_112 : f32 to vector<4x512xf32>
    %149 = arith.maximumf %147, %148 : vector<4x512xf32>
    %150 = vector.extract_strided_slice %149 {offsets = [0, 0], sizes = [4, 256], strides = [1, 1]} : vector<4x512xf32> to vector<4x256xf32>
    %c0_113 = arith.constant 0 : index
    %c0_114 = arith.constant 0 : index
    %151 = vector.load %arg8[%c0_113, %c0_114] : memref<8x256xf32, #tpu.memory_space<vmem>>, vector<4x256xf32>
    tpu.vector_store %arg8[%c0_113, %c0_114], %150 {strides = array<i32>} : memref<8x256xf32, #tpu.memory_space<vmem>>, vector<4x256xf32>,
    %152 = vector.extract_strided_slice %149 {offsets = [0, 256], sizes = [4, 256], strides = [1, 1]} : vector<4x512xf32> to vector<4x256xf32>
    %c4_115 = arith.constant 4 : index
    %c0_116 = arith.constant 0 : index
    %153 = vector.load %arg8[%c4_115, %c0_116] : memref<8x256xf32, #tpu.memory_space<vmem>>, vector<4x256xf32>
    tpu.vector_store %arg8[%c4_115, %c0_116], %152 {strides = array<i32>} : memref<8x256xf32, #tpu.memory_space<vmem>>, vector<4x256xf32>,
    return
  }
}

</mosaic_0001>

<bundles_post_ra>
// kernel: expanding_block_forward.1
= control target key start
LH: loop header
LB: loop body
LE: loop exit
PB: predicated region body
PF: predicated region fallthrough
CT: control target
= control target key end

     0   :  { %vm49_vm0 = vcmask 523264   ;;  %s2372_s19 = smov 127   ;;  %s2373_s20 = smov 111   ;;  %vm129_vm1 = vcmask 1039360   ;;  %vm137_vm2 = vcmask 64512   ;;  %v2374_v31 = vmov 0   ;;  %s2839_s2 = inlined_call_operand.vmem [shape: f32[64,256], index: 2, kind: input, shape index: {}]   ;;  %s2840_s0 = inlined_call_operand.vmem [shape: f32[16,64], index: 0, kind: input, shape index: {}]   ;;  %s2841_s4 = inlined_call_operand.vmem [shape: f32[16,8], index: 4, kind: input, shape index: {}]   ;;  %s2842_s7 = inlined_call_operand.vmem [shape: f32[4,5], index: 7, kind: input, shape index: {}]   ;;  %s2843_s1 = inlined_call_operand.vmem [shape: f32[4,640], index: 1, kind: input, shape index: {}]   ;;  %s2844_s3 = inlined_call_operand.vmem [shape: f32[1,495], index: 3, kind: input, shape index: {}]   ;;  %s2845_s5 = inlined_call_operand.vmem [shape: f32[36,8], index: 5, kind: input, shape index: {}]   ;;  %s2846_s6 = inlined_call_operand.vmem [shape: f32[16,4], index: 6, kind: input, shape index: {}]   ;;  %s2847_s8 = inlined_call_operand.vmem [shape: f32[8,256], index: 8, kind: output, shape index: {}]  }
   0x1   :  { %v47_v0 = vld [vmem:[%s2839_s2 + $0x70] sm:$0xff]  ;;  %v48_v1 = vld [vmem:[%s2839_s2 + $0x78] sm:$0xff]  ;;  %v45_v2 = vld [vmem:[%s2839_s2 + $0x60] sm:$0xff]  ;;  %2277 = vset.pattern.permute.xlu0 %v2374_v31  ;;  %vm313_vm3 = vcmask 916480   ;;  %vm417_vm4 = vcmask 908288   ;;  %vm107_vm5 = vcmask 1044344  }
   0x2   :  { %64 = vmatpush.msra.mxu0 %v47_v0  ;;  %87 = vmatpush.msra.mxu1 %v48_v1  ;;  %v46_v3 = vld [vmem:[%s2839_s2 + $0x68] sm:$0xff]  ;;  %v43_v4 = vld [vmem:[%s2839_s2 + $0x50] sm:$0xff]  ;;  %v44_v5 = vld [vmem:[%s2839_s2 + $0x58] sm:$0xff]  ;;  %vm537_vm6 = vcmask 904192   ;;  %s2378_s15 = smov 15   ;;  %s2379_s16 = smov 1  }
   0x3   :  { %v41_v6 = vld [vmem:[%s2839_s2 + $0x40] sm:$0xff]  ;;  %v42_v7 = vld [vmem:[%s2839_s2 + $0x48] sm:$0xff]  ;;  %v39_v8 = vld [vmem:[%s2839_s2 + $0x30] sm:$0xff]  ;;  %s2380_s17 = smov 113   ;;  %vm588_vm7 = vcmask 130048   ;;  %vm690_vm8 = vcmask 138240  }
   0x4   :  { %65 = vmatpush.msra.mxu0 %v45_v2  ;;  %88 = vmatpush.msra.mxu1 %v46_v3  ;;  %v40_v9 = vld [vmem:[%s2839_s2 + $0x38] sm:$0xff]  ;;  %v37_v10 = vld [vmem:[%s2839_s2 + $0x20] sm:$0xff]  ;;  %v38_v11 = vld [vmem:[%s2839_s2 + $0x28] sm:$0xff]  ;;  %v2375_v3 = vmov 0.0   ;;  %vm793_vm9 = vcmask 121856   ;;  %vm900_vm10 = vcmask 7168  }
   0x5   :  { %v35_v12 = vld [vmem:[%s2839_s2 + $0x10] sm:$0xff]  ;;  %v36_v13 = vld [vmem:[%s2839_s2 + $0x18] sm:$0xff]  ;;  %v33_v14 = vld [vmem:[%s2839_s2] sm:$0xff]  ;;  %106 = vst [vmem:[#allocation3] sm:$0xf] %v2375_v3  ;;  %vm1196_vm11 = vcmask 924672  }
   0x6   :  { %66 = vmatpush.msra.mxu0 %v43_v4  ;;  %89 = vmatpush.msra.mxu1 %v44_v5  ;;  %v34_v15 = vld [vmem:[%s2839_s2 + $0x8] sm:$0xff]  ;;  %v31_v16 = vld [vmem:[%s2840_s0] sm:$0xff]  ;;  %s2371_s2 = smov 112   ;;  %v541_v62 = vld [vmem:[%s2843_s1 + $0x10] sm:$0xf]  ;;  %vm1509_vm12 = vcmask 1043456  }
   0x7   :  { %v32_v17 = vld [vmem:[%s2840_s0 + $0x8] sm:$0xff]  ;;  %v116_v27 = vld [vmem:[%s2841_s4 + $0x4] sm:$0xf]  ;;  %v2506_v35 = vld [vmem:[%s2842_s7] sm:$0xf] }
   0x8   :  { %67 = vmatpush.msra.mxu0 %v41_v6  ;;  %90 = vmatpush.msra.mxu1 %v42_v7  ;;  %v304_v40 = vld [vmem:[%s2841_s4 + $0x8] sm:$0xf]  ;;  %v111_v44 = vld [vmem:[%s2841_s4] sm:$0xf]  ;;  %v408_v51 = vld [vmem:[%s2841_s4 + $0xc] sm:$0xf] }
   0x9   :  { %v539_v54 = vld [vmem:[%s2843_s1] sm:$0xff]  ;;  %v540_v55 = vld [vmem:[%s2843_s1 + $0x8] sm:$0xff]  ;;  %550 = vst [vmem:[#allocation1 + $0x21] ss:$2 sm:$0xff] %v541_v62  ;;  %s2376_s1 = smov 16  }
   0xa   :  { %68 = vmatpush.msra.mxu0 %v39_v8  ;;  %91 = vmatpush.msra.mxu1 %v40_v9  ;;  %546 = vst [vmem:[#allocation1 + $0x1] ss:$2 sm:$0xff] %v539_v54  ;;  %v30_v2 = vld [vmem:[%s2844_s3] sm:$0xf]  ;;  %s2377_s3 = smov 17  }
   0xb   :  { %548 = vst [vmem:[#allocation1 + $0x11] ss:$2 sm:$0xff] %v540_v55  ;;  %v2550_v8 = vperm.slane %v30_v2, 0  ;;  %v2556_v31 = vperm.slane %v30_v2, 2  ;;  %v572_v62 = vld [vmem:[%s2845_s5 + $0x4] sm:$0xf] }
   0xc   :  { %69 = vmatpush.msra.mxu0 %v37_v10  ;;  %92 = vmatpush.msra.mxu1 %v38_v11  ;;  %108 = vst.msk [vmem:[#allocation3 + $0x20] sm:$0xf] %vm107_vm5, %v2375_v3 }
   0xd   :  { %109 = vst [vmem:[#allocation4] sm:$0xf] %v2375_v3 }
   0xe   :  { %70 = vmatpush.msra.mxu0 %v35_v12  ;;  %93 = vmatpush.msra.mxu1 %v36_v13  ;;  %110 = vst.msk [vmem:[#allocation4 + $0x10] sm:$0xf] %vm107_vm5, %v2375_v3 }
  0x10   :  { %71 = vmatpush.msra.mxu0 %v33_v14  ;;  %94 = vmatpush.msra.mxu1 %v34_v15  ;;  %v555_v12 = vld.sshfl [vmem:[#allocation1 + $0x20] sm:$0xff pattern:$0x75316420] }
  0x11   :  { %2158 = vmatmul.msk.f32.vlgmr.msra.gmra.mxu0 %vm49_vm0, %v31_v16  ;;  %2160 = vmatmul.msk.f32.vlgmr.msra.gmra.mxu1 %vm49_vm0, %v31_v16  ;;  %v552_v56 = vld.sshfl [vmem:[#allocation1 + $0x8] sm:$0xff pattern:$0x75316420]  ;;  %v551_v11 = vld.sshfl [vmem:[#allocation1] sm:$0xff pattern:$0x75316420] }
  0x12   :  { %562 = vst [vmem:[#allocation3 + $0x8] sm:$0xf0] %v552_v56  ;;  %v553_v58 = vld.sshfl [vmem:[#allocation1 + $0x10] sm:$0xff pattern:$0x75316420] }
  0x13   :  { %563 = vst [vmem:[#allocation3 + $0x10] sm:$0xf0] %v553_v58  ;;  %v554_v5 = vld.sshfl [vmem:[#allocation1 + $0x18] sm:$0xff pattern:$0x75316420] }
  0x14   :  { %564 = vst [vmem:[#allocation3 + $0x18] sm:$0xf0] %v554_v5 }
  0x15   :  { %561 = vst [vmem:[#allocation3] sm:$0xf0] %v551_v11 }
  0x16   :  { %565 = vst [vmem:[#allocation3 + $0x20] sm:$0xf0] %v555_v12 }
  0x19   :  { %2159 = vmatmul.msk.f32.gmra.mxu0 %vm49_vm0, %v32_v17  ;;  %2161 = vmatmul.msk.f32.gmra.mxu1 %vm49_vm0, %v32_v17 }
  0x8e   :  { %v73_v18 = vpop.f32.mrf.mxu0  ;;  %v96_v19 = vpop.f32.mrf.mxu1 }
  0x8f   :  { %307 = vrot.lane.b32.xlu2 %v96_v19, %s2371_s2  ;;  %v2262_v20 = vpack.i.bf16 %v96_v19, %v73_v18 }
  0x91   :  { %2263 = vrot.lane.b32.xlu0 %v2262_v20, %s2372_s19 }
  0x96   :  { %v76_v21 = vpop.f32.mrf.mxu0  ;;  %v99_v22 = vpop.f32.mrf.mxu1 }
  0x97   :  { %127 = vrot.lane.b32.xlu1 %v99_v22, %s2372_s19  ;;  %v2272_v23 = vpack.i.bf16 %v99_v22, %v76_v21 }
  0x99   :  { %2273 = vrot.lane.b32.xlu2 %v2272_v23, %s2373_s20  ;;  %125 = vrot.lane.b32.xlu0 %v76_v21, %s2372_s19 }
  0x9f   :  { %2268 = vrot.lane.b32.xlu1 %v2272_v23, %s2371_s2 }
  0xa1   :  { %409 = vrot.lane.b32.xlu2 %v73_v18, %s2373_s20  ;;  %305 = vrot.lane.b32.xlu0 %v73_v18, %s2371_s2 }
  0xa7   :  { %411 = vrot.lane.b32.xlu1 %v96_v19, %s2373_s20 }
  0xa9   :  { %514 = vperm.xlu0 %2277, %v2506_v35  }
  0xe9   :  { %v308_v29 = vpop.permute.xlu2 %307 }
  0xf3   :  { %v2274_v36 = vpop.permute.xlu2 %2273 }
  0xf4   :  { %v2275_v45 = vunpack.i.l.bf16 %v2274_v36  ;;  %v2276_v52 = vunpack.i.h.bf16 %v2274_v36 }
  0xf6   :  { %v420_v53 = vsel %vm417_vm4, %v2275_v45, %v2276_v52 }
  0xfb   :  { %v410_v47 = vpop.permute.xlu2 %409 }
 0x103   :  { %v2264_v24 = vpop.permute.xlu0 %2263 }
 0x104   :  { %v2266_v25 = vunpack.i.h.bf16 %v2264_v24  ;;  %v2265_v26 = vunpack.i.l.bf16 %v2264_v24 }
 0x106   :  { %v130_v28 = vsel %vm129_vm1, %v2265_v26, %v2266_v25 }
 0x107   :  { %156 = vmatpush.msra.mxu2 %v130_v28 }
 0x108   :  { %2162 = vmatmul.msk.f32.vlgmr.msra.gmra.mxu2 %vm137_vm2, %v116_v27 }
 0x109   :  { %v128_v30 = vpop.permute.xlu1 %127 }
 0x10b   :  { %v126_v32 = vpop.permute.xlu0 %125 }
 0x10c   :  { %v131_v33 = vsel %vm129_vm1, %v2266_v25, %v126_v32  ;;  %v132_v34 = vsel %vm129_vm1, %v126_v32, %v128_v30 }
 0x10d   :  { %176 = vmatpush.msra.mxu3 %v131_v33  ;;  %196 = vmatpush.msrb.mxu2 %v132_v34 }
 0x10e   :  { %2163 = vmatmul.msk.f32.vlgmr.msra.gmra.mxu3 %vm137_vm2, %v116_v27 }
 0x10f   :  { %239 = vmatpush.msra.mxu2 %v73_v18  ;;  %216 = vmatpush.msrb.mxu3 %v128_v30 }
 0x110   :  { %2164 = vmatmul.msk.f32.vlgmr.msrb.gmra.mxu2 %vm137_vm2, %v116_v27 }
 0x111   :  { %259 = vmatpush.msra.mxu3 %v96_v19  ;;  %279 = vmatpush.msrb.mxu2 %v76_v21  ;;  %v2269_v37 = vpop.permute.xlu1 %2268  ;;  %v2553_v21 = vperm.slane %v30_v2, 1 }
 0x112   :  { %v2270_v38 = vunpack.i.l.bf16 %v2269_v37  ;;  %v2271_v41 = vunpack.i.h.bf16 %v2269_v37 }
 0x113   :  { %v306_v39 = vpop.permute.xlu0 %305 }
 0x114   :  { %v314_v42 = vsel %vm313_vm3, %v306_v39, %v308_v29  ;;  %v315_v43 = vsel %vm313_vm3, %v308_v29, %v2270_v38  ;;  %v316_v46 = vsel %vm313_vm3, %v2270_v38, %v2271_v41  ;;  %v2559_v39 = vperm.slane %v30_v2, 3 }
 0x115   :  { %339 = vmatpush.msrb.mxu0 %v314_v42  ;;  %359 = vmatpush.msrb.mxu1 %v315_v43 }
 0x116   :  { %2165 = vmatmul.msk.f32.vlgmr.msrb.gmra.mxu3 %vm137_vm2, %v116_v27  ;;  %2170 = vmatmul.msk.f32.vlgmr.msrb.gmra.mxu0 %vm137_vm2, %v304_v40 }
 0x117   :  { %299 = vmatpush.msrb.mxu3 %v99_v22  ;;  %2171 = vmatmul.msk.f32.vlgmr.msrb.gmra.mxu1 %vm137_vm2, %v304_v40 }
 0x118   :  { %2166 = vmatmul.msk.f32.vlgmr.msra.gmra.mxu2 %vm137_vm2, %v111_v44 }
 0x119   :  { %379 = vmatpush.msra.mxu2 %v316_v46  ;;  %v412_v48 = vpop.permute.xlu1 %411 }
 0x11a   :  { %v418_v49 = vsel %vm417_vm4, %v410_v47, %v412_v48  ;;  %v419_v50 = vsel %vm417_vm4, %v412_v48, %v2275_v45  ;;  %v567_v45 = vld [vmem:[#allocation3] sm:$0xff] }
 0x11b   :  { %443 = vmatpush.msra.mxu0 %v418_v49  ;;  %463 = vmatpush.msra.mxu1 %v419_v50  ;;  %v515_v9 = vpop.permute.xlu0 %514 }
 0x11e   :  { %2167 = vmatmul.msk.f32.vlgmr.msra.gmra.mxu3 %vm137_vm2, %v111_v44  ;;  %2174 = vmatmul.msk.f32.vlgmr.msra.gmra.mxu0 %vm137_vm2, %v408_v51 }
 0x11f   :  { %399 = vmatpush.msra.mxu3 %v2271_v41  ;;  %2175 = vmatmul.msk.f32.vlgmr.msra.gmra.mxu1 %vm137_vm2, %v408_v51 }
 0x120   :  { %2168 = vmatmul.msk.f32.vlgmr.msrb.gmra.mxu2 %vm137_vm2, %v111_v44 }
 0x121   :  { %483 = vmatpush.msrb.mxu2 %v420_v53 }
 0x126   :  { %2169 = vmatmul.msk.f32.vlgmr.msrb.gmra.mxu3 %vm137_vm2, %v111_v44 }
 0x127   :  { %503 = vmatpush.msrb.mxu3 %v2276_v52 }
 0x128   :  { %2172 = vmatmul.msk.f32.vlgmr.msra.gmra.mxu2 %vm137_vm2, %v304_v40 }
 0x12e   :  { %2173 = vmatmul.msk.f32.vlgmr.msra.gmra.mxu3 %vm137_vm2, %v304_v40 }
 0x130   :  { %2176 = vmatmul.msk.f32.vlgmr.msrb.gmra.mxu2 %vm137_vm2, %v408_v51 }
 0x136   :  { %2177 = vmatmul.msk.f32.vlgmr.msrb.gmra.mxu3 %vm137_vm2, %v408_v51 }
 0x18b   :  { %v158_v57 = vpop.f32.mrf.mxu2 }
 0x191   :  { %v178_v59 = vpop.f32.mrf.mxu3 }
 0x193   :  { %v198_v60 = vpop.f32.mrf.mxu2  ;;  %v341_v61 = vpop.f32.mrf.mxu0 }
 0x194   :  { %v361_v0 = vpop.f32.mrf.mxu1 }
 0x199   :  { %v218_v63 = vpop.f32.mrf.mxu3 }
 0x19b   :  { %v241_v1 = vpop.f32.mrf.mxu2  ;;  %v445_v6 = vpop.f32.mrf.mxu0 }
 0x19c   :  { %v242_v4 = vadd.f32 %v241_v1, %v158_v57  ;;  %v465_v17 = vpop.f32.mrf.mxu1 }
 0x19e   :  { %v404_v7 = vadd.f32 %v341_v61, %v242_v4 }
 0x1a0   :  { %v508_v10 = vadd.f32 %v445_v6, %v404_v7 }
 0x1a1   :  { %v261_v13 = vpop.f32.mrf.mxu3 }
 0x1a2   :  { %v262_v14 = vadd.f32 %v261_v13, %v178_v59  ;;  %v517_v15 = vadd.f32 %v515_v9, %v508_v10 }
 0x1a3   :  { %v281_v16 = vpop.f32.mrf.mxu2 }
 0x1a4   :  { %v530_v18 = vmul.f32 %v2550_v8, %v517_v15  ;;  %v405_v19 = vadd.f32 %v361_v0, %v262_v14  ;;  %v282_v26 = vadd.f32 %v281_v16, %v198_v60  ;;  %v566_v14 = vld [vmem:[%s2845_s5] sm:$0xf] }
 0x1a6   :  { %534 = vst [vmem:[#allocation3 + $0x8] sm:$0xf] %v530_v18  ;;  %v509_v20 = vadd.f32 %v465_v17, %v405_v19 }
 0x1a8   :  { %v518_v22 = vadd.f32 %v515_v9, %v509_v20 }
 0x1a9   :  { %v301_v23 = vpop.f32.mrf.mxu3 }
 0x1aa   :  { %v531_v24 = vmul.f32 %v2553_v21, %v518_v22  ;;  %v302_v32 = vadd.f32 %v301_v23, %v218_v63 }
 0x1ab   :  { %v381_v25 = vpop.f32.mrf.mxu2 }
 0x1ac   :  { %535 = vst [vmem:[#allocation3 + $0x10] sm:$0xf] %v531_v24  ;;  %v406_v28 = vadd.f32 %v381_v25, %v282_v26  ;;  %v782_v24 = vld [vmem:[%s2845_s5 + $0x8] sm:$0xf] }
 0x1ad   :  { %v2575_v48 = vld [vmem:[#allocation3 + $0x8] sm:$0xff] }
 0x1b1   :  { %v401_v27 = vpop.f32.mrf.mxu3 }
 0x1b2   :  { %v407_v34 = vadd.f32 %v401_v27, %v302_v32 }
 0x1b3   :  { %v485_v29 = vpop.f32.mrf.mxu2  ;;  %v2563_v42 = vld [vmem:[#allocation3 + $0x10] sm:$0xff] }
 0x1b4   :  { %v510_v30 = vadd.f32 %v485_v29, %v406_v28  ;;  %v2323_v49 = vpack.i.bf16 %v2563_v42, %v2575_v48 }
 0x1b6   :  { %v519_v33 = vadd.f32 %v515_v9, %v510_v30 }
 0x1b8   :  { %v532_v36 = vmul.f32 %v2556_v31, %v519_v33 }
 0x1b9   :  { %v505_v37 = vpop.f32.mrf.mxu3 }
 0x1ba   :  { %536 = vst [vmem:[#allocation3 + $0x18] sm:$0xf] %v532_v36  ;;  %v511_v38 = vadd.f32 %v505_v37, %v407_v34  ;;  %v889_v37 = vld [vmem:[%s2845_s5 + $0xc] sm:$0xf] }
 0x1bc   :  { %v520_v40 = vadd.f32 %v515_v9, %v511_v38 }
 0x1be   :  { %v533_v41 = vmul.f32 %v2559_v39, %v520_v40 }
 0x1c0   :  { %538 = vst.msk [vmem:[#allocation3 + $0x20] sm:$0xf] %vm537_vm6, %v533_v41 }
 0x1c1   :  { %v2565_v43 = vld [vmem:[#allocation3 + $0x18] sm:$0xff] }
 0x1c2   :  { %v2278_v44 = vpack.i.bf16 %v2565_v43, %v2563_v42 }
 0x1c4   :  { %2279 = vrot.lane.b32.xlu1 %v2278_v44, %s2376_s1 }
 0x1c7   :  { %v2570_v46 = vld [vmem:[#allocation3 + $0x20] sm:$0xff] }
 0x1c8   :  { %v2303_v47 = vpack.i.bf16 %v567_v45, %v2570_v46  ;;  %v2318_v50 = vpack.i.bf16 %v2570_v46, %v2565_v43 }
 0x1ca   :  { %2304 = vrot.lane.b32.xlu0 %v2303_v47, %s2377_s3  ;;  %2284 = vrot.lane.b32.xlu2 %v2303_v47, %s2376_s1 }
 0x1cc   :  { %580 = vrot.lane.b32.xlu1 %v2575_v48, %s2376_s1 }
 0x1d2   :  { %2309 = vrot.lane.b32.xlu0 %v2303_v47, %s2378_s15  ;;  %2289 = vrot.lane.b32.xlu2 %v2278_v44, %s2377_s3 }
 0x1d4   :  { %682 = vrot.lane.b32.xlu1 %v2575_v48, %s2377_s3 }
 0x1da   :  { %2314 = vrot.lane.b32.xlu0 %v2303_v47, %s2379_s16  ;;  %2294 = vrot.lane.b32.xlu2 %v2278_v44, %s2378_s15 }
 0x1dc   :  { %785 = vrot.lane.b32.xlu1 %v2575_v48, %s2378_s15 }
 0x1e2   :  { %2299 = vrot.lane.b32.xlu2 %v2278_v44, %s2379_s16  ;;  %2324 = vrot.lane.b32.xlu0 %v2323_v49, %s2372_s19 }
 0x1e4   :  { %892 = vrot.lane.b32.xlu1 %v2575_v48, %s2379_s16 }
 0x1ea   :  { %2319 = vrot.lane.b32.xlu2 %v2318_v50, %s2372_s19  ;;  %2339 = vrot.lane.b32.xlu0 %v2318_v50, %s2371_s2 }
 0x1ec   :  { %2329 = vrot.lane.b32.xlu1 %v2318_v50, %s2380_s17 }
 0x1f2   :  { %2334 = vrot.lane.b32.xlu2 %v2323_v49, %s2380_s17  ;;  %2354 = vrot.lane.b32.xlu0 %v2323_v49, %s2373_s20 }
 0x1f4   :  { %2344 = vrot.lane.b32.xlu1 %v2323_v49, %s2371_s2 }
 0x1fa   :  { %2349 = vrot.lane.b32.xlu2 %v2318_v50, %s2373_s20 }
 0x224   :  { %v2285_v51 = vpop.permute.xlu2 %2284 }
 0x225   :  { %v2286_v54 = vunpack.i.l.bf16 %v2285_v51  ;;  %v2287_v5 = vunpack.i.h.bf16 %v2285_v51 }
 0x22c   :  { %v2290_v52 = vpop.permute.xlu2 %2289 }
 0x22d   :  { %v2292_v56 = vunpack.i.h.bf16 %v2290_v52  ;;  %v2291_v57 = vunpack.i.l.bf16 %v2290_v52 }
 0x22f   :  { %v693_v1 = vsel %vm690_vm8, %v2291_v57, %v2292_v56 }
 0x234   :  { %v2597_v53 = vpop.permute.xlu2 %2294 }
 0x235   :  { %v2297_v60 = vunpack.i.h.bf16 %v2597_v53  ;;  %v2296_v61 = vunpack.i.l.bf16 %v2597_v53 }
 0x236   :  { %v2280_v55 = vpop.permute.xlu1 %2279 }
 0x237   :  { %v2282_v58 = vunpack.i.h.bf16 %v2280_v55  ;;  %v2281_v59 = vunpack.i.l.bf16 %v2280_v55  ;;  %v796_v4 = vsel %vm793_vm9, %v2296_v61, %v2297_v60 }
 0x239   :  { %v591_v63 = vsel %vm588_vm7, %v2281_v59, %v2282_v58  ;;  %v592_v0 = vsel %vm588_vm7, %v2282_v58, %v2286_v54 }
 0x23a   :  { %655 = vmatpush.msra.mxu2 %v591_v63  ;;  %675 = vmatpush.msra.mxu3 %v592_v0 }
 0x23b   :  { %2180 = vmatmul.msk.f32.vlgmr.msra.gmra.mxu2 %vm137_vm2, %v572_v62  ;;  %2181 = vmatmul.msk.f32.vlgmr.msra.gmra.mxu3 %vm137_vm2, %v572_v62 }
 0x23c   :  { %757 = vmatpush.msrb.mxu2 %v693_v1  ;;  %v2305_v2 = vpop.permute.xlu0 %2304  ;;  %v2609_v3 = vpop.permute.xlu2 %2299 }
 0x23d   :  { %v2306_v6 = vunpack.i.l.bf16 %v2305_v2  ;;  %v2302_v7 = vunpack.i.h.bf16 %v2609_v3  ;;  %v2301_v10 = vunpack.i.l.bf16 %v2609_v3  ;;  %v2307_v17 = vunpack.i.h.bf16 %v2305_v2 }
 0x23e   :  { %860 = vmatpush.msra.mxu2 %v796_v4  ;;  %v581_v9 = vpop.permute.xlu1 %580  ;;  %v2381_v2 = vmov 1  }
 0x23f   :  { %v589_v11 = vsel %vm588_vm7, %v2287_v5, %v581_v9  ;;  %v590_v12 = vsel %vm588_vm7, %v581_v9, %v2281_v59  ;;  %v694_v13 = vsel %vm690_vm8, %v2292_v56, %v2306_v6  ;;  %v903_v15 = vsel %vm900_vm10, %v2301_v10, %v2302_v7  ;;  %2358 = vset.pattern.permute.xlu1 %v2381_v2 }
 0x240   :  { %615 = vmatpush.msrb.mxu0 %v589_v11  ;;  %635 = vmatpush.msrb.mxu1 %v590_v12 }
 0x241   :  { %777 = vmatpush.msrb.mxu3 %v694_v13  ;;  %2178 = vmatmul.msk.f32.vlgmr.msrb.gmra.mxu0 %vm137_vm2, %v572_v62 }
 0x242   :  { %2179 = vmatmul.msk.f32.vlgmr.msrb.gmra.mxu1 %vm137_vm2, %v572_v62  ;;  %v1084_v62 = vld [vmem:[%s2845_s5 + $0x14] sm:$0xf]  ;;  %1498 = vperm.xlu1 %2358, %v2506_v35  }
 0x243   :  { %2184 = vmatmul.msk.f32.vlgmr.msrb.gmra.mxu2 %vm137_vm2, %v566_v14  ;;  %2185 = vmatmul.msk.f32.vlgmr.msrb.gmra.mxu3 %vm137_vm2, %v566_v14 }
 0x244   :  { %967 = vmatpush.msrb.mxu2 %v903_v15  ;;  %v2310_v16 = vpop.permute.xlu0 %2309  ;;  %v2320_v25 = vpop.permute.xlu2 %2319 }
 0x245   :  { %v2311_v18 = vunpack.i.l.bf16 %v2310_v16  ;;  %v2312_v27 = vunpack.i.h.bf16 %v2310_v16  ;;  %v2322_v29 = vunpack.i.h.bf16 %v2320_v25  ;;  %v2321_v32 = vunpack.i.l.bf16 %v2320_v25  ;;  %v1291_v16 = vld [vmem:[%s2845_s5 + $0x1c] sm:$0xf] }
 0x246   :  { %v683_v19 = vpop.permute.xlu1 %682 }
 0x247   :  { %v691_v20 = vsel %vm690_vm8, %v2307_v17, %v683_v19  ;;  %v692_v22 = vsel %vm690_vm8, %v683_v19, %v2291_v57  ;;  %v797_v23 = vsel %vm793_vm9, %v2297_v60, %v2311_v18  ;;  %v1095_v38 = vsel %vm129_vm1, %v2321_v32, %v2322_v29  ;;  %v1394_v18 = vld [vmem:[%s2845_s5 + $0x20] sm:$0xf] }
 0x248   :  { %717 = vmatpush.msra.mxu0 %v691_v20  ;;  %737 = vmatpush.msra.mxu1 %v692_v22 }
 0x249   :  { %880 = vmatpush.msra.mxu3 %v797_v23  ;;  %2182 = vmatmul.msk.f32.vlgmr.msra.gmra.mxu0 %vm137_vm2, %v566_v14 }
 0x24a   :  { %2183 = vmatmul.msk.f32.vlgmr.msra.gmra.mxu1 %vm137_vm2, %v566_v14 }
 0x24b   :  { %2188 = vmatmul.msk.f32.vlgmr.msra.gmra.mxu2 %vm137_vm2, %v782_v24  ;;  %2189 = vmatmul.msk.f32.vlgmr.msra.gmra.mxu3 %vm137_vm2, %v782_v24 }
 0x24c   :  { %1055 = vmatpush.msra.mxu2 %v2565_v43  ;;  %v2315_v26 = vpop.permute.xlu0 %2314  ;;  %v2335_v50 = vpop.permute.xlu2 %2334 }
 0x24d   :  { %v2316_v28 = vunpack.i.l.bf16 %v2315_v26  ;;  %v2317_v41 = vunpack.i.h.bf16 %v2315_v26  ;;  %v2336_v53 = vunpack.i.l.bf16 %v2335_v50 }
 0x24e   :  { %v786_v30 = vpop.permute.xlu1 %785 }
 0x24f   :  { %v794_v33 = vsel %vm793_vm9, %v2312_v27, %v786_v30  ;;  %v795_v34 = vsel %vm793_vm9, %v786_v30, %v2296_v61  ;;  %v904_v36 = vsel %vm900_vm10, %v2302_v7, %v2316_v28 }
 0x250   :  { %820 = vmatpush.msrb.mxu0 %v794_v33  ;;  %840 = vmatpush.msrb.mxu1 %v795_v34 }
 0x251   :  { %987 = vmatpush.msrb.mxu3 %v904_v36  ;;  %2186 = vmatmul.msk.f32.vlgmr.msrb.gmra.mxu0 %vm137_vm2, %v782_v24 }
 0x252   :  { %2187 = vmatmul.msk.f32.vlgmr.msrb.gmra.mxu1 %vm137_vm2, %v782_v24 }
 0x253   :  { %1075 = vmatpush.msra.mxu3 %v2570_v46  ;;  %2192 = vmatmul.msk.f32.vlgmr.msrb.gmra.mxu2 %vm137_vm2, %v889_v37  ;;  %v996_v46 = vld [vmem:[%s2845_s5 + $0x10] sm:$0xf] }
 0x254   :  { %2193 = vmatmul.msk.f32.vlgmr.msrb.gmra.mxu3 %vm137_vm2, %v889_v37  ;;  %1158 = vmatpush.msrb.mxu2 %v1095_v38  ;;  %v2325_v40 = vpop.permute.xlu0 %2324  ;;  %v2350_v0 = vpop.permute.xlu2 %2349 }
 0x255   :  { %1178 = vmatpush.msrb.mxu3 %v2322_v29  ;;  %v2327_v43 = vunpack.i.h.bf16 %v2325_v40  ;;  %v2326_v44 = vunpack.i.l.bf16 %v2325_v40  ;;  %v2352_v5 = vunpack.i.h.bf16 %v2350_v0  ;;  %v2351_v6 = vunpack.i.l.bf16 %v2350_v0 }
 0x256   :  { %v893_v45 = vpop.permute.xlu1 %892 }
 0x257   :  { %v901_v47 = vsel %vm900_vm10, %v2317_v41, %v893_v45  ;;  %v902_v49 = vsel %vm900_vm10, %v893_v45, %v2301_v10  ;;  %v1093_v51 = vsel %vm129_vm1, %v2326_v44, %v2327_v43  ;;  %v1094_v52 = vsel %vm129_vm1, %v2327_v43, %v2321_v32  ;;  %v1187_v10 = vld [vmem:[%s2845_s5 + $0x18] sm:$0xf] }
 0x258   :  { %927 = vmatpush.msra.mxu0 %v901_v47  ;;  %947 = vmatpush.msra.mxu1 %v902_v49  ;;  %v1405_v12 = vsel %vm417_vm4, %v2351_v6, %v2352_v5  ;;  %vm1597_vm1 = vcmask 908292  }
 0x259   :  { %2190 = vmatmul.msk.f32.vlgmr.msra.gmra.mxu0 %vm137_vm2, %v889_v37 }
 0x25a   :  { %1035 = vmatpush.msrb.mxu1 %v2563_v42  ;;  %1015 = vmatpush.msrb.mxu0 %v2575_v48  ;;  %v2337_v42 = vunpack.i.h.bf16 %v2335_v50 }
 0x25b   :  { %2191 = vmatmul.msk.f32.vlgmr.msra.gmra.mxu1 %vm137_vm2, %v889_v37  ;;  %2196 = vmatmul.msk.f32.vlgmr.msra.gmra.mxu2 %vm137_vm2, %v996_v46 }
 0x25c   :  { %1118 = vmatpush.msra.mxu0 %v1093_v51  ;;  %1138 = vmatpush.msra.mxu1 %v1094_v52  ;;  %v2340_v54 = vpop.permute.xlu0 %2339  ;;  %v1197_v48 = vsel %vm1196_vm11, %v2336_v53, %v2337_v42 }
 0x25d   :  { %2197 = vmatmul.msk.f32.vlgmr.msra.gmra.mxu3 %vm137_vm2, %v996_v46  ;;  %v2342_v58 = vunpack.i.h.bf16 %v2340_v54  ;;  %v2341_v59 = vunpack.i.l.bf16 %v2340_v54 }
 0x25e   :  { %v2330_v55 = vpop.permute.xlu1 %2329 }
 0x25f   :  { %v2332_v56 = vunpack.i.h.bf16 %v2330_v55  ;;  %v2331_v57 = vunpack.i.l.bf16 %v2330_v55  ;;  %v1302_v63 = vsel %vm313_vm3, %v2341_v59, %v2342_v58 }
 0x261   :  { %2194 = vmatmul.msk.f32.vlgmr.msrb.gmra.mxu0 %vm137_vm2, %v996_v46  ;;  %1282 = vmatpush.msra.mxu3 %v2332_v56  ;;  %v1198_v60 = vsel %vm1196_vm11, %v2337_v42, %v2331_v57  ;;  %v1199_v61 = vsel %vm1196_vm11, %v2331_v57, %v2332_v56  ;;  %v2382_v42 = vmov 3  }
 0x262   :  { %1222 = vmatpush.msrb.mxu0 %v1197_v48  ;;  %1262 = vmatpush.msra.mxu2 %v1199_v61 }
 0x263   :  { %2195 = vmatmul.msk.f32.vlgmr.msrb.gmra.mxu1 %vm137_vm2, %v996_v46  ;;  %2200 = vmatmul.msk.f32.vlgmr.msrb.gmra.mxu2 %vm137_vm2, %v1084_v62 }
 0x264   :  { %1242 = vmatpush.msrb.mxu1 %v1198_v60  ;;  %1365 = vmatpush.msrb.mxu2 %v1302_v63  ;;  %v2355_v11 = vpop.permute.xlu0 %2354 }
 0x265   :  { %2201 = vmatmul.msk.f32.vlgmr.msrb.gmra.mxu3 %vm137_vm2, %v1084_v62  ;;  %v2357_v13 = vunpack.i.h.bf16 %v2355_v11  ;;  %v2356_v14 = vunpack.i.l.bf16 %v2355_v11  ;;  %2359 = vset.pattern.permute.xlu1 %v2382_v42 }
 0x266   :  { %1385 = vmatpush.msrb.mxu3 %v2342_v58  ;;  %v2345_v1 = vpop.permute.xlu1 %2344  ;;  %1563 = vperm.xlu1 %2359, %v2506_v35  }
 0x267   :  { %v2347_v3 = vunpack.i.h.bf16 %v2345_v1  ;;  %v2346_v4 = vunpack.i.l.bf16 %v2345_v1  ;;  %v1403_v15 = vsel %vm417_vm4, %v2356_v14, %v2357_v13  ;;  %v1404_v17 = vsel %vm417_vm4, %v2357_v13, %v2351_v6 }
 0x269   :  { %2198 = vmatmul.msk.f32.vlgmr.msra.gmra.mxu0 %vm137_vm2, %v1084_v62  ;;  %v1300_v7 = vsel %vm313_vm3, %v2346_v4, %v2347_v3  ;;  %v1301_v9 = vsel %vm313_vm3, %v2347_v3, %v2341_v59  ;;  %vm1632_vm3 = vcmask 31744  }
 0x26a   :  { %1325 = vmatpush.msra.mxu0 %v1300_v7 }
 0x26b   :  { %2199 = vmatmul.msk.f32.vlgmr.msra.gmra.mxu1 %vm137_vm2, %v1084_v62  ;;  %2204 = vmatmul.msk.f32.vlgmr.msra.gmra.mxu2 %vm137_vm2, %v1187_v10 }
 0x26c   :  { %1345 = vmatpush.msra.mxu1 %v1301_v9  ;;  %1468 = vmatpush.msra.mxu2 %v1405_v12 }
 0x26d   :  { %2205 = vmatmul.msk.f32.vlgmr.msra.gmra.mxu3 %vm137_vm2, %v1187_v10 }
 0x26e   :  { %1488 = vmatpush.msra.mxu3 %v2352_v5 }
 0x271   :  { %2202 = vmatmul.msk.f32.vlgmr.msrb.gmra.mxu0 %vm137_vm2, %v1187_v10 }
 0x272   :  { %1428 = vmatpush.msrb.mxu0 %v1403_v15 }
 0x273   :  { %2203 = vmatmul.msk.f32.vlgmr.msrb.gmra.mxu1 %vm137_vm2, %v1187_v10  ;;  %2208 = vmatmul.msk.f32.vlgmr.msrb.gmra.mxu2 %vm137_vm2, %v1291_v16  ;;  %v2383_v10 = vmov 4  }
 0x274   :  { %1448 = vmatpush.msrb.mxu1 %v1404_v17  ;;  %2360 = vset.pattern.permute.xlu1 %v2383_v10 }
 0x275   :  { %2209 = vmatmul.msk.f32.vlgmr.msrb.gmra.mxu3 %vm137_vm2, %v1291_v16  ;;  %1571 = vperm.xlu1 %2360, %v2506_v35  }
 0x279   :  { %2206 = vmatmul.msk.f32.vlgmr.msra.gmra.mxu0 %vm137_vm2, %v1291_v16 }
 0x27b   :  { %2207 = vmatmul.msk.f32.vlgmr.msra.gmra.mxu1 %vm137_vm2, %v1291_v16  ;;  %2212 = vmatmul.msk.f32.vlgmr.msra.gmra.mxu2 %vm137_vm2, %v1394_v18 }
 0x27d   :  { %2213 = vmatmul.msk.f32.vlgmr.msra.gmra.mxu3 %vm137_vm2, %v1394_v18 }
 0x281   :  { %2210 = vmatmul.msk.f32.vlgmr.msrb.gmra.mxu0 %vm137_vm2, %v1394_v18 }
 0x283   :  { %2211 = vmatmul.msk.f32.vlgmr.msrb.gmra.mxu1 %vm137_vm2, %v1394_v18  ;;  %vm1598_vm2 = vmor %vm1597_vm1, %vm1509_vm12 }
 0x2be   :  { %v617_v19 = vpop.f32.mrf.mxu0  ;;  %v657_v20 = vpop.f32.mrf.mxu2 }
 0x2bf   :  { %v637_v22 = vpop.f32.mrf.mxu1  ;;  %v677_v23 = vpop.f32.mrf.mxu3 }
 0x2c6   :  { %v719_v24 = vpop.f32.mrf.mxu0  ;;  %v759_v25 = vpop.f32.mrf.mxu2 }
 0x2c7   :  { %v739_v26 = vpop.f32.mrf.mxu1  ;;  %v779_v27 = vpop.f32.mrf.mxu3  ;;  %v720_v53 = vadd.f32 %v719_v24, %v617_v19  ;;  %v760_v55 = vadd.f32 %v759_v25, %v657_v20 }
 0x2c8   :  { %v740_v54 = vadd.f32 %v739_v26, %v637_v22  ;;  %v780_v56 = vadd.f32 %v779_v27, %v677_v23  ;;  %v1499_v23 = vpop.permute.xlu1 %1498 }
 0x2ce   :  { %v822_v28 = vpop.f32.mrf.mxu0  ;;  %v862_v29 = vpop.f32.mrf.mxu2 }
 0x2cf   :  { %v842_v30 = vpop.f32.mrf.mxu1  ;;  %v882_v32 = vpop.f32.mrf.mxu3  ;;  %v885_v57 = vadd.f32 %v822_v28, %v720_v53  ;;  %v887_v59 = vadd.f32 %v862_v29, %v760_v55 }
 0x2d0   :  { %v886_v58 = vadd.f32 %v842_v30, %v740_v54  ;;  %v888_v48 = vadd.f32 %v882_v32, %v780_v56 }
 0x2d6   :  { %v929_v33 = vpop.f32.mrf.mxu0  ;;  %v969_v34 = vpop.f32.mrf.mxu2 }
 0x2d7   :  { %v989_v37 = vpop.f32.mrf.mxu3  ;;  %v992_v60 = vadd.f32 %v929_v33, %v885_v57  ;;  %v994_v62 = vadd.f32 %v969_v34, %v887_v59 }
 0x2d8   :  { %v949_v36 = vpop.f32.mrf.mxu1  ;;  %v995_v0 = vadd.f32 %v989_v37, %v888_v48 }
 0x2d9   :  { %v993_v61 = vadd.f32 %v949_v36, %v886_v58 }
 0x2de   :  { %v1017_v38 = vpop.f32.mrf.mxu0  ;;  %v1057_v41 = vpop.f32.mrf.mxu2 }
 0x2df   :  { %v1080_v1 = vadd.f32 %v1017_v38, %v992_v60  ;;  %v1082_v5 = vadd.f32 %v1057_v41, %v994_v62  ;;  %v2384_v60 = vmov 450.0  }
 0x2e0   :  { %v1037_v40 = vpop.f32.mrf.mxu1  ;;  %v1077_v43 = vpop.f32.mrf.mxu3  ;;  %2362 = vrcp.f32 %v2384_v60 }
 0x2e1   :  { %v1081_v4 = vadd.f32 %v1037_v40, %v993_v61  ;;  %v1083_v7 = vadd.f32 %v1077_v43, %v995_v0 }
 0x2e6   :  { %v1120_v44 = vpop.f32.mrf.mxu0  ;;  %v1160_v47 = vpop.f32.mrf.mxu2 }
 0x2e7   :  { %v1183_v9 = vadd.f32 %v1120_v44, %v1080_v1  ;;  %v1185_v12 = vadd.f32 %v1160_v47, %v1082_v5  ;;  %v2363_v61 = vpop.eup %2362 }
 0x2e8   :  { %v1140_v45 = vpop.f32.mrf.mxu1  ;;  %v1180_v49 = vpop.f32.mrf.mxu3  ;;  %v1520_v62 = vmul.f32 450.0, %v2363_v61  ;;  %vm1524_vm13 = vweird.f32 %v2363_v61 }
 0x2e9   :  { %v1184_v11 = vadd.f32 %v1140_v45, %v1081_v4  ;;  %v1186_v13 = vadd.f32 %v1180_v49, %v1083_v7 }
 0x2ee   :  { %v1224_v46 = vpop.f32.mrf.mxu0  ;;  %v1264_v51 = vpop.f32.mrf.mxu2 }
 0x2ef   :  { %v1287_v14 = vadd.f32 %v1224_v46, %v1183_v9  ;;  %v1289_v16 = vadd.f32 %v1264_v51, %v1185_v12 }
 0x2f0   :  { %v1244_v50 = vpop.f32.mrf.mxu1  ;;  %v1284_v52 = vpop.f32.mrf.mxu3 }
 0x2f1   :  { %v1288_v15 = vadd.f32 %v1244_v50, %v1184_v11  ;;  %v1290_v17 = vadd.f32 %v1284_v52, %v1186_v13 }
 0x2f6   :  { %v1327_v63 = vpop.f32.mrf.mxu0  ;;  %v1367_v3 = vpop.f32.mrf.mxu2 }
 0x2f7   :  { %v1390_v18 = vadd.f32 %v1327_v63, %v1287_v14  ;;  %v1392_v20 = vadd.f32 %v1367_v3, %v1289_v16  ;;  %v1521_v63 = vsub.f32 1.0, %v1520_v62  ;;  %v2712_v14 = vpop.permute.xlu1 %1563 }
 0x2f8   :  { %v1347_v2 = vpop.f32.mrf.mxu1  ;;  %v1387_v6 = vpop.f32.mrf.mxu3 }
 0x2f9   :  { %v1391_v19 = vadd.f32 %v1347_v2, %v1288_v15  ;;  %v1393_v24 = vadd.f32 %v1387_v6, %v1290_v17  ;;  %v1522_v0 = vmul.f32 %v2363_v61, %v1521_v63 }
 0x2fb   :  { %v1523_v1 = vadd.f32 %v2363_v61, %v1522_v0 }
 0x2fd   :  { %v1525_v2 = vsel %vm1524_vm13, %v2363_v61, %v1523_v1 }
 0x2fe   :  { %v1430_v22 = vpop.f32.mrf.mxu0  ;;  %v1470_v27 = vpop.f32.mrf.mxu2 }
 0x2ff   :  { %v1493_v25 = vadd.f32 %v1430_v22, %v1390_v18  ;;  %v1495_v29 = vadd.f32 %v1470_v27, %v1392_v20 }
 0x300   :  { %v1450_v26 = vpop.f32.mrf.mxu1  ;;  %v1490_v30 = vpop.f32.mrf.mxu3 }
 0x301   :  { %v1494_v28 = vadd.f32 %v1450_v26, %v1391_v19  ;;  %v1496_v32 = vadd.f32 %v1490_v30, %v1393_v24  ;;  %v1501_v33 = vadd.f32 %v1499_v23, %v1493_v25  ;;  %v1503_v34 = vadd.f32 %v1499_v23, %v1495_v29 }
 0x303   :  { %v1502_v35 = vadd.f32 %v1499_v23, %v1494_v28  ;;  %v1504_v36 = vadd.f32 %v1499_v23, %v1496_v32  ;;  %v1505_v37 = vmul.f32 %v1501_v33, %v2550_v8  ;;  %v1507_v40 = vmul.f32 %v1503_v34, %v2556_v31  ;;  %v2714_v28 = vpop.permute.xlu1 %1571 }
 0x305   :  { %v1506_v38 = vmul.f32 %v1502_v35, %v2553_v21  ;;  %v1508_v41 = vmul.f32 %v1504_v36, %v2559_v39  ;;  %v1510_v43 = vsel %vm1509_vm12, %v1505_v37, 0.0  ;;  %v1527_v44 = vmul.f32 %v1505_v37, %v1505_v37 }
 0x306   :  { %v1529_v49 = vmul.f32 %v1507_v40, %v1507_v40  ;;  %v1513_v51 = vsel %vm1509_vm12, %v1507_v40, 0.0 }
 0x307   :  { %v1511_v45 = vsel %vm1509_vm12, %v1506_v38, 0.0  ;;  %v1528_v47 = vmul.f32 %v1506_v38, %v1506_v38  ;;  %v1531_v50 = vsel %vm1509_vm12, %v1527_v44, 0.0  ;;  %v1530_v52 = vmul.f32 %v1508_v41, %v1508_v41 }
 0x308   :  { %v1512_v46 = vadd.f32 %v1511_v45, %v1510_v43  ;;  %v1515_v55 = vsel %vm537_vm6, %v1508_v41, 0.0  ;;  %v1534_v56 = vsel %vm1509_vm12, %v1529_v49, 0.0 }
 0x309   :  { %v1532_v42 = vsel %vm1509_vm12, %v1528_v47, 0.0  ;;  %v1536_v59 = vsel %vm537_vm6, %v1530_v52, 0.0 }
 0x30a   :  { %v1514_v53 = vadd.f32 %v1513_v51, %v1512_v46  ;;  %v1533_v54 = vadd.f32 %v1532_v42, %v1531_v50 }
 0x30c   :  { %v1516_v57 = vadd.f32 %v1515_v55, %v1514_v53  ;;  %v1535_v58 = vadd.f32 %v1534_v56, %v1533_v54 }
 0x30e   :  { %1517 = vadd.xlane.f32.xlu2 %v1516_v57  ;;  %v1537_v48 = vadd.f32 %v1536_v59, %v1535_v58 }
 0x310   :  { %1538 = vadd.xlane.f32.xlu0 %v1537_v48 }
 0x381   :  { %v1518_v3 = vpop.xlane.xlu2 %1517 }
 0x382   :  { %v1526_v4 = vmul.f32 %v1525_v2, %v1518_v3 }
 0x383   :  { %v1539_v5 = vpop.xlane.xlu0 %1538 }
 0x384   :  { %v1540_v6 = vmul.f32 %v1539_v5, %v1525_v2  ;;  %v1541_v7 = vmul.f32 %v1526_v4, %v1526_v4  ;;  %v1543_v18 = vsub.f32 %v1505_v37, %v1526_v4  ;;  %v1544_v19 = vsub.f32 %v1506_v38, %v1526_v4  ;;  %v1604_v5 = vld [vmem:[%s2846_s6 + $0x4] sm:$0xf] }
 0x385   :  { %v1545_v20 = vsub.f32 %v1507_v40, %v1526_v4  ;;  %v1546_v22 = vsub.f32 %v1508_v41, %v1526_v4 }
 0x386   :  { %v1542_v9 = vsub.f32 %v1540_v6, %v1541_v7 }
 0x388   :  { %v1547_v10 = vadd.f32 1e-05, %v1542_v9 }
 0x38a   :  { %2364 = vrsqrt.f32 %v1547_v10  ;;  %vm1554_vm15 = vweird.f32 %v1547_v10 }
 0x390   :  { %v2365_v11 = vpop.eup %2364 }
 0x391   :  { %v1549_v12 = vmul.f32 %v2365_v11, %v1547_v10  ;;  %vm1555_vm14 = vweird.f32 %v2365_v11 }
 0x392   :  { %vm1556_vm0 = vmor %vm1554_vm15, %vm1555_vm14 }
 0x393   :  { %v1550_v13 = vmul.f32 %v2365_v11, %v1549_v12 }
 0x395   :  { %v1551_v15 = vmul.f32 0.5, %v1550_v13 }
 0x397   :  { %v1552_v16 = vsub.f32 1.5, %v1551_v15 }
 0x399   :  { %v1553_v17 = vmul.f32 %v2365_v11, %v1552_v16 }
 0x39b   :  { %v1557_v23 = vsel %vm1556_vm0, %v2365_v11, %v1553_v17 }
 0x39c   :  { %v1558_v24 = vmul.f32 %v1557_v23, %v1543_v18  ;;  %v1559_v25 = vmul.f32 %v1557_v23, %v1544_v19  ;;  %v1560_v26 = vmul.f32 %v1557_v23, %v1545_v20  ;;  %v1561_v27 = vmul.f32 %v1557_v23, %v1546_v22  ;;  %v1600_v22 = vld [vmem:[%s2846_s6] sm:$0xf] }
 0x39e   :  { %v1566_v29 = vmul.f32 %v2712_v14, %v1558_v24  ;;  %v1567_v30 = vmul.f32 %v2712_v14, %v1559_v25  ;;  %v1568_v32 = vmul.f32 %v2712_v14, %v1560_v26  ;;  %v1569_v33 = vmul.f32 %v2712_v14, %v1561_v27  ;;  %v2370_v26 = vld [vmem:[%s2842_s7] sm:$0xf] }
 0x39f   :  { %v2385_v24 = vmov 2  }
 0x3a0   :  { %v1574_v35 = vadd.f32 %v2714_v28, %v1566_v29  ;;  %v1575_v34 = vadd.f32 %v2714_v28, %v1567_v30  ;;  %v1576_v36 = vadd.f32 %v2714_v28, %v1568_v32  ;;  %v1577_v37 = vadd.f32 %v2714_v28, %v1569_v33  ;;  %2361 = vset.pattern.permute.xlu0 %v2385_v24 }
 0x3a2   :  { %v1578_v38 = vmax.f32 %v1574_v35, 0.0  ;;  %v1579_v40 = vmax.f32 %v1575_v34, 0.0  ;;  %v1580_v41 = vmax.f32 %v1576_v36, 0.0  ;;  %v1581_v43 = vmax.f32 %v1577_v37, 0.0  ;;  %v1839_v36 = vld [vmem:[%s2846_s6 + $0x8] sm:$0xf] }
 0x3a4   :  { %v1583_v44 = vmul.f32 %v1579_v40, %v2553_v21  ;;  %v1585_v45 = vmul.f32 %v1581_v43, %v2559_v39  ;;  %v1582_v47 = vmul.f32 %v1578_v38, %v2550_v8  ;;  %v1584_v49 = vmul.f32 %v1580_v41, %v2556_v31 }
 0x3a6   :  { %v1590_v46 = vrot.slane %v1583_v44, 4  ;;  %v1591_v50 = vrot.slane %v1585_v45, 4  ;;  %v1965_v44 = vld [vmem:[%s2846_s6 + $0xc] sm:$0xf] }
 0x3a8   :  { %v1592_v51 = vsel %vm1509_vm12, %v1582_v47, %v1590_v46  ;;  %v1593_v52 = vsel %vm1509_vm12, %v1584_v49, %v1591_v50 }
 0x3a9   :  { %1596 = vst [vmem:[#allocation4 + $0x4] sm:$0xff] %v1592_v51 }
 0x3aa   :  { %1599 = vst.msk [vmem:[#allocation4 + $0xc] sm:$0xff] %vm1598_vm2, %v1593_v52 }
 0x3b0   :  { %v1601_v42 = vld [vmem:[#allocation4] sm:$0xff] }
 0x3b1   :  { %v1602_v53 = vld [vmem:[#allocation4 + $0x8] sm:$0xff]  ;;  %1608 = vst [vmem:[#allocation1] ss:$2 sm:$0xff] %v1601_v42  ;;  %v1603_v21 = vld [vmem:[#allocation4 + $0x10] sm:$0xf] }
 0x3b2   :  { %1610 = vst [vmem:[#allocation1 + $0x10] ss:$2 sm:$0xff] %v1602_v53  ;;  %v1842_v58 = vld [vmem:[#allocation4 + $0x10] sm:$0xf] }
 0x3b3   :  { %1612 = vst [vmem:[#allocation1 + $0x20] ss:$2 sm:$0xff] %v1603_v21  ;;  %v1967_v63 = vld [vmem:[#allocation4 + $0xc] sm:$0xff] }
 0x3b8   :  { %v1613_v39 = vld.sshfl [vmem:[#allocation1] sm:$0xff pattern:$0x75316420]  ;;  %v1614_v8 = vld.sshfl [vmem:[#allocation1 + $0x8] sm:$0xff pattern:$0x75316420] }
 0x3b9   :  { %v1615_v54 = vld.sshfl [vmem:[#allocation1 + $0x10] sm:$0xff pattern:$0x75316420]  ;;  %1618 = vrot.lane.b32.xlu2 %v1613_v39, %s2376_s1  ;;  %1724 = vst [vmem:[#allocation1] ss:$2 sm:$0xff] %v1601_v42 }
 0x3ba   :  { %1622 = vrot.lane.b32.xlu1 %v1615_v54, %s2376_s1  ;;  %v1616_v31 = vld.sshfl [vmem:[#allocation1 + $0x18] sm:$0xff pattern:$0x75316420]  ;;  %v1617_v55 = vld.sshfl [vmem:[#allocation1 + $0x20] sm:$0xff pattern:$0x75316420] }
 0x3bb   :  { %1726 = vst [vmem:[#allocation1 + $0x10] ss:$2 sm:$0xff] %v1602_v53 }
 0x3bc   :  { %1728 = vst [vmem:[#allocation1 + $0x20] ss:$2 sm:$0xff] %v1603_v21 }
 0x3c0   :  { %v1729_v56 = vld.sshfl [vmem:[#allocation1] sm:$0xff pattern:$0x75316420]  ;;  %v1730_v57 = vld.sshfl [vmem:[#allocation1 + $0x8] sm:$0xff pattern:$0x75316420] }
 0x3c1   :  { %1734 = vrot.lane.b32.xlu2 %v1729_v56, %s2377_s3  ;;  %1846 = vst [vmem:[#allocation1] ss:$2 sm:$0xff] %v1601_v42 }
 0x3c2   :  { %1624 = vrot.lane.b32.xlu1 %v1616_v31, %s2376_s1  ;;  %v1731_v59 = vld.sshfl [vmem:[#allocation1 + $0x10] sm:$0xff pattern:$0x75316420]  ;;  %v1732_v48 = vld.sshfl [vmem:[#allocation1 + $0x18] sm:$0xff pattern:$0x75316420] }
 0x3c3   :  { %1738 = vrot.lane.b32.xlu0 %v1731_v59, %s2377_s3  ;;  %1848 = vst [vmem:[#allocation1 + $0x10] ss:$2 sm:$0xff] %v1602_v53  ;;  %v1733_v60 = vld.sshfl [vmem:[#allocation1 + $0x20] sm:$0xff pattern:$0x75316420] }
 0x3c4   :  { %1850 = vst [vmem:[#allocation1 + $0x20] ss:$2 sm:$0xff] %v1842_v58 }
 0x3c8   :  { %v1852_v61 = vld.sshfl [vmem:[#allocation1 + $0x8] sm:$0xff pattern:$0x75316420]  ;;  %v1851_v62 = vld.sshfl [vmem:[#allocation1] sm:$0xff pattern:$0x75316420] }
 0x3c9   :  { %1970 = vst [vmem:[#allocation1] ss:$2 sm:$0xff] %v1592_v51 }
 0x3ca   :  { %1626 = vrot.lane.b32.xlu1 %v1617_v55, %s2376_s1  ;;  %v1854_v0 = vld.sshfl [vmem:[#allocation1 + $0x18] sm:$0xff pattern:$0x75316420]  ;;  %v1853_v1 = vld.sshfl [vmem:[#allocation1 + $0x10] sm:$0xff pattern:$0x75316420] }
 0x3cb   :  { %1736 = vrot.lane.b32.xlu0 %v1730_v57, %s2377_s3  ;;  %1862 = vrot.lane.b32.xlu2 %v1854_v0, %s2379_s16  ;;  %1972 = vst [vmem:[#allocation1 + $0x10] ss:$2 sm:$0xff] %v1967_v63  ;;  %v1855_v2 = vld.sshfl [vmem:[#allocation1 + $0x20] sm:$0xff pattern:$0x75316420] }
 0x3d0   :  { %v1974_v40 = vld.sshfl [vmem:[#allocation1 + $0x8] sm:$0xff pattern:$0x75316420]  ;;  %v1973_v47 = vld.sshfl [vmem:[#allocation1] sm:$0xff pattern:$0x75316420] }
 0x3d2   :  { %1620 = vrot.lane.b32.xlu1 %v1614_v8, %s2376_s1  ;;  %v1976_v33 = vld.sshfl [vmem:[#allocation1 + $0x18] sm:$0xff pattern:$0x75316420]  ;;  %v1975_v41 = vld.sshfl [vmem:[#allocation1 + $0x10] sm:$0xff pattern:$0x75316420] }
 0x3d3   :  { %1864 = vrot.lane.b32.xlu0 %v1855_v2, %s2379_s16  ;;  %1858 = vrot.lane.b32.xlu2 %v1852_v61, %s2379_s16 }
 0x3da   :  { %1740 = vrot.lane.b32.xlu1 %v1732_v48, %s2377_s3 }
 0x3db   :  { %2073 = vperm.xlu0 %2361, %v2370_v26  }
 0x3e2   :  { %1742 = vrot.lane.b32.xlu1 %v1733_v60, %s2377_s3 }
 0x3ea   :  { %1860 = vrot.lane.b32.xlu1 %v1853_v1, %s2379_s16 }
 0x3f2   :  { %1856 = vrot.lane.b32.xlu1 %v1851_v62, %s2379_s16 }
 0x413   :  { %v1619_v9 = vpop.permute.xlu2 %1618 }
 0x41b   :  { %v1735_v15 = vpop.permute.xlu2 %1734 }
 0x425   :  { %v1863_v25 = vpop.permute.xlu2 %1862 }
 0x42c   :  { %v1623_v3 = vpop.permute.xlu1 %1622 }
 0x42d   :  { %v1859_v35 = vpop.permute.xlu2 %1858 }
 0x434   :  { %v1625_v4 = vpop.permute.xlu1 %1624 }
 0x435   :  { %v1630_v6 = vsel %vm588_vm7, %v1623_v3, %v1625_v4  ;;  %v1739_v7 = vpop.permute.xlu0 %1738 }
 0x436   :  { %2218 = vmatpush.msk.msrb.mxu2 %vm1509_vm12, %v1630_v6 }
 0x437   :  { %2219 = vmatmul.msk.f32.vlgmr.msrb.gmra.mxu2 %vm1632_vm3, %v1604_v5 }
 0x43c   :  { %v1627_v10 = vpop.permute.xlu1 %1626 }
 0x43d   :  { %v1631_v11 = vsel %vm588_vm7, %v1625_v4, %v1627_v10  ;;  %v1737_v12 = vpop.permute.xlu0 %1736 }
 0x43e   :  { %2220 = vmatpush.msk.msrb.mxu3 %vm1509_vm12, %v1631_v11  ;;  %v1744_v18 = vsel %vm690_vm8, %v1735_v15, %v1737_v12  ;;  %v1745_v19 = vsel %vm690_vm8, %v1737_v12, %v1739_v7 }
 0x43f   :  { %2221 = vmatmul.msk.f32.vlgmr.msrb.gmra.mxu3 %vm1632_vm3, %v1604_v5 }
 0x444   :  { %v1621_v13 = vpop.permute.xlu1 %1620 }
 0x445   :  { %v1628_v16 = vsel %vm588_vm7, %v1619_v9, %v1621_v13  ;;  %v1629_v17 = vsel %vm588_vm7, %v1621_v13, %v1623_v3  ;;  %v1865_v27 = vpop.permute.xlu0 %1864 }
 0x446   :  { %2214 = vmatpush.msk.msra.mxu0 %vm1509_vm12, %v1628_v16  ;;  %2216 = vmatpush.msk.msra.mxu1 %vm1509_vm12, %v1629_v17  ;;  %v1869_v32 = vsel %vm900_vm10, %v1863_v25, %v1865_v27 }
 0x447   :  { %2217 = vmatmul.msk.f32.vlgmr.msra.gmra.mxu1 %vm1632_vm3, %v1604_v5  ;;  %2215 = vmatmul.msk.f32.vlgmr.msra.gmra.mxu0 %vm1632_vm3, %v1604_v5 }
 0x448   :  { %2222 = vmatpush.msk.msrb.mxu0 %vm1509_vm12, %v1744_v18  ;;  %2224 = vmatpush.msk.msrb.mxu1 %vm1509_vm12, %v1745_v19 }
 0x44c   :  { %v1741_v20 = vpop.permute.xlu1 %1740 }
 0x44d   :  { %v1746_v23 = vsel %vm690_vm8, %v1739_v7, %v1741_v20  ;;  %v2074_v48 = vpop.permute.xlu0 %2073 }
 0x44e   :  { %2226 = vmatpush.msk.msra.mxu2 %vm1509_vm12, %v1746_v23 }
 0x44f   :  { %2227 = vmatmul.msk.f32.vlgmr.msra.gmra.mxu2 %vm1632_vm3, %v1600_v22  ;;  %2225 = vmatmul.msk.f32.vlgmr.msrb.gmra.mxu1 %vm1632_vm3, %v1600_v22 }
 0x450   :  { %2223 = vmatmul.msk.f32.vlgmr.msrb.gmra.mxu0 %vm1632_vm3, %v1600_v22 }
 0x454   :  { %v1743_v29 = vpop.permute.xlu1 %1742 }
 0x455   :  { %v1747_v30 = vsel %vm690_vm8, %v1741_v20, %v1743_v29 }
 0x456   :  { %2228 = vmatpush.msk.msra.mxu3 %vm1509_vm12, %v1747_v30 }
 0x457   :  { %2229 = vmatmul.msk.f32.vlgmr.msra.gmra.mxu3 %vm1632_vm3, %v1600_v22 }
 0x458   :  { %2236 = vmatpush.msk.msrb.mxu3 %vm1509_vm12, %v1869_v32 }
 0x45a   :  { %2244 = vmatpush.msk.msra.mxu3 %vm1509_vm12, %v1976_v33 }
 0x45c   :  { %v1861_v34 = vpop.permute.xlu1 %1860 }
 0x45d   :  { %v1867_v37 = vsel %vm900_vm10, %v1859_v35, %v1861_v34  ;;  %v1868_v38 = vsel %vm900_vm10, %v1861_v34, %v1863_v25 }
 0x45e   :  { %2232 = vmatpush.msk.msra.mxu1 %vm1509_vm12, %v1867_v37  ;;  %2234 = vmatpush.msk.msrb.mxu2 %vm1509_vm12, %v1868_v38 }
 0x45f   :  { %2233 = vmatmul.msk.f32.vlgmr.msra.gmra.mxu1 %vm1632_vm3, %v1839_v36  ;;  %2235 = vmatmul.msk.f32.vlgmr.msrb.gmra.mxu2 %vm1632_vm3, %v1839_v36 }
 0x460   :  { %2237 = vmatmul.msk.f32.vlgmr.msrb.gmra.mxu3 %vm1632_vm3, %v1839_v36  ;;  %2240 = vmatpush.msk.msrb.mxu1 %vm1509_vm12, %v1974_v40 }
 0x461   :  { %2242 = vmatpush.msk.msra.mxu2 %vm1509_vm12, %v1975_v41 }
 0x464   :  { %v1857_v43 = vpop.permute.xlu1 %1856 }
 0x465   :  { %v1866_v45 = vsel %vm900_vm10, %v1857_v43, %v1859_v35  ;;  %v2386_v35 = vmov 512.0  }
 0x466   :  { %2230 = vmatpush.msk.msra.mxu0 %vm1509_vm12, %v1866_v45  ;;  %2366 = vrcp.f32 %v2386_v35 }
 0x467   :  { %2231 = vmatmul.msk.f32.vlgmr.msra.gmra.mxu0 %vm1632_vm3, %v1839_v36  ;;  %2241 = vmatmul.msk.f32.vlgmr.msrb.gmra.mxu1 %vm1632_vm3, %v1965_v44 }
 0x468   :  { %2238 = vmatpush.msk.msrb.mxu0 %vm1509_vm12, %v1973_v47  ;;  %2243 = vmatmul.msk.f32.vlgmr.msra.gmra.mxu2 %vm1632_vm3, %v1965_v44 }
 0x469   :  { %2245 = vmatmul.msk.f32.vlgmr.msra.gmra.mxu3 %vm1632_vm3, %v1965_v44 }
 0x46c   :  { %v2367_v34 = vpop.eup %2366 }
 0x46d   :  { %v2090_v36 = vmul.f32 512.0, %v2367_v34  ;;  %vm2094_vm4 = vweird.f32 %v2367_v34 }
 0x46f   :  { %2239 = vmatmul.msk.f32.vlgmr.msrb.gmra.mxu0 %vm1632_vm3, %v1965_v44  ;;  %v2091_v37 = vsub.f32 1.0, %v2090_v36 }
 0x471   :  { %v2092_v38 = vmul.f32 %v2367_v34, %v2091_v37 }
 0x473   :  { %v2093_v40 = vadd.f32 %v2367_v34, %v2092_v38 }
 0x475   :  { %v2095_v41 = vsel %vm2094_vm4, %v2367_v34, %v2093_v40 }
 0x4ba   :  { %v1701_v46 = vpop.f32.mrf.mxu2 }
 0x4c2   :  { %v1721_v50 = vpop.f32.mrf.mxu3 }
 0x4c4   :  { %v1681_v49 = vpop.f32.mrf.mxu1  ;;  %v1661_v51 = vpop.f32.mrf.mxu0 }
 0x4cc   :  { %v1796_v52 = vpop.f32.mrf.mxu1 }
 0x4cd   :  { %v1776_v21 = vpop.f32.mrf.mxu0  ;;  %v1797_v54 = vadd.f32 %v1796_v52, %v1681_v49 }
 0x4ce   :  { %v1777_v61 = vadd.f32 %v1776_v21, %v1661_v51 }
 0x4d2   :  { %v1816_v42 = vpop.f32.mrf.mxu2 }
 0x4d3   :  { %v1817_v59 = vadd.f32 %v1816_v42, %v1701_v46 }
 0x4da   :  { %v1836_v53 = vpop.f32.mrf.mxu3 }
 0x4db   :  { %v1837_v60 = vadd.f32 %v1836_v53, %v1721_v50 }
 0x4dc   :  { %v1918_v39 = vpop.f32.mrf.mxu1 }
 0x4dd   :  { %v1962_v57 = vadd.f32 %v1918_v39, %v1797_v54 }
 0x4e2   :  { %v1938_v8 = vpop.f32.mrf.mxu2 }
 0x4e3   :  { %v1958_v31 = vpop.f32.mrf.mxu3  ;;  %v1963_v62 = vadd.f32 %v1938_v8, %v1817_v59 }
 0x4e4   :  { %v1898_v55 = vpop.f32.mrf.mxu0  ;;  %v2025_v56 = vpop.f32.mrf.mxu1  ;;  %v1964_v63 = vadd.f32 %v1958_v31, %v1837_v60 }
 0x4e5   :  { %v2069_v58 = vadd.f32 %v2025_v56, %v1962_v57  ;;  %v1961_v0 = vadd.f32 %v1898_v55, %v1777_v61 }
 0x4e7   :  { %v2805_v1 = vadd.f32 %v2074_v48, %v2069_v58 }
 0x4e9   :  { %v2098_v10 = vmul.f32 %v2805_v1, %v2805_v1  ;;  %v2081_v16 = vsel %vm1509_vm12, %v2805_v1, 0.0 }
 0x4eb   :  { %v2045_v2 = vpop.f32.mrf.mxu2  ;;  %v2102_v23 = vsel %vm1509_vm12, %v2098_v10, 0.0 }
 0x4ec   :  { %v2070_v3 = vadd.f32 %v2045_v2, %v1963_v62  ;;  %v2065_v4 = vpop.f32.mrf.mxu3  ;;  %v2005_v5 = vpop.f32.mrf.mxu0 }
 0x4ed   :  { %v2071_v6 = vadd.f32 %v2065_v4, %v1964_v63  ;;  %v2068_v7 = vadd.f32 %v2005_v5, %v1961_v0 }
 0x4ee   :  { %v2078_v9 = vadd.f32 %v2074_v48, %v2070_v3 }
 0x4ef   :  { %v2079_v11 = vadd.f32 %v2074_v48, %v2071_v6  ;;  %v2076_v12 = vadd.f32 %v2074_v48, %v2068_v7 }
 0x4f0   :  { %v2099_v17 = vmul.f32 %v2078_v9, %v2078_v9  ;;  %v2083_v19 = vsel %vm1509_vm12, %v2078_v9, 0.0 }
 0x4f1   :  { %v2097_v13 = vmul.f32 %v2076_v12, %v2076_v12  ;;  %v2080_v15 = vsel %vm1509_vm12, %v2076_v12, 0.0  ;;  %v2100_v20 = vmul.f32 %v2079_v11, %v2079_v11  ;;  %v2085_v26 = vsel %vm1509_vm12, %v2079_v11, 0.0 }
 0x4f2   :  { %v2082_v18 = vadd.f32 %v2081_v16, %v2080_v15  ;;  %v2104_v27 = vsel %vm1509_vm12, %v2099_v17, 0.0 }
 0x4f3   :  { %v2101_v22 = vsel %vm1509_vm12, %v2097_v13, 0.0  ;;  %v2106_v32 = vsel %vm1509_vm12, %v2100_v20, 0.0 }
 0x4f4   :  { %v2084_v24 = vadd.f32 %v2083_v19, %v2082_v18  ;;  %v2103_v25 = vadd.f32 %v2102_v23, %v2101_v22 }
 0x4f6   :  { %v2086_v29 = vadd.f32 %v2085_v26, %v2084_v24  ;;  %v2105_v30 = vadd.f32 %v2104_v27, %v2103_v25 }
 0x4f8   :  { %2087 = vadd.xlane.f32.xlu1 %v2086_v29  ;;  %v2107_v33 = vadd.f32 %v2106_v32, %v2105_v30 }
 0x4fa   :  { %2108 = vadd.xlane.f32.xlu2 %v2107_v33 }
 0x56b   :  { %v2088_v43 = vpop.xlane.xlu1 %2087 }
 0x56c   :  { %v2096_v44 = vmul.f32 %v2095_v41, %v2088_v43 }
 0x56d   :  { %v2109_v45 = vpop.xlane.xlu2 %2108 }
 0x56e   :  { %v2110_v47 = vmul.f32 %v2109_v45, %v2095_v41  ;;  %v2111_v49 = vmul.f32 %v2096_v44, %v2096_v44  ;;  %v2113_v8 = vsub.f32 %v2076_v12, %v2096_v44  ;;  %v2114_v54 = vsub.f32 %v2805_v1, %v2096_v44 }
 0x56f   :  { %v2115_v31 = vsub.f32 %v2078_v9, %v2096_v44  ;;  %v2116_v55 = vsub.f32 %v2079_v11, %v2096_v44 }
 0x570   :  { %v2112_v46 = vsub.f32 %v2110_v47, %v2111_v49 }
 0x572   :  { %v2117_v50 = vadd.f32 1e-05, %v2112_v46 }
 0x574   :  { %2368 = vrsqrt.f32 %v2117_v50  ;;  %vm2124_vm6 = vweird.f32 %v2117_v50 }
 0x57a   :  { %v2369_v51 = vpop.eup %2368 }
 0x57b   :  { %v2119_v52 = vmul.f32 %v2369_v51, %v2117_v50  ;;  %vm2125_vm5 = vweird.f32 %v2369_v51 }
 0x57c   :  { %vm2126_vm7 = vmor %vm2124_vm6, %vm2125_vm5 }
 0x57d   :  { %v2120_v42 = vmul.f32 %v2369_v51, %v2119_v52 }
 0x57f   :  { %v2121_v53 = vmul.f32 0.5, %v2120_v42 }
 0x581   :  { %v2122_v21 = vsub.f32 1.5, %v2121_v53 }
 0x583   :  { %v2123_v39 = vmul.f32 %v2369_v51, %v2122_v21 }
 0x585   :  { %v2127_v56 = vsel %vm2126_vm7, %v2369_v51, %v2123_v39 }
 0x586   :  { %v2128_v57 = vmul.f32 %v2127_v56, %v2113_v8  ;;  %v2129_v58 = vmul.f32 %v2127_v56, %v2114_v54  ;;  %v2130_v59 = vmul.f32 %v2127_v56, %v2115_v31  ;;  %v2131_v48 = vmul.f32 %v2127_v56, %v2116_v55 }
 0x588   :  { %v2132_v60 = vmul.f32 %v2128_v57, %v2712_v14  ;;  %v2133_v61 = vmul.f32 %v2129_v58, %v2712_v14  ;;  %v2134_v62 = vmul.f32 %v2130_v59, %v2712_v14  ;;  %v2135_v63 = vmul.f32 %v2131_v48, %v2712_v14 }
 0x58a   :  { %v2136_v0 = vadd.f32 %v2132_v60, %v2714_v28  ;;  %v2137_v1 = vadd.f32 %v2133_v61, %v2714_v28  ;;  %v2138_v2 = vadd.f32 %v2134_v62, %v2714_v28  ;;  %v2139_v3 = vadd.f32 %v2135_v63, %v2714_v28 }
 0x58c   :  { %v2140_v4 = vmax.f32 %v2136_v0, 0.0  ;;  %v2141_v5 = vmax.f32 %v2137_v1, 0.0  ;;  %v2142_v6 = vmax.f32 %v2138_v2, 0.0  ;;  %v2143_v7 = vmax.f32 %v2139_v3, 0.0 }
 0x58e   :  { %2144 = vst [vmem:[%s2847_s8] sm:$0xf] %v2140_v4  ;;  %v2148_v9 = vrot.slane %v2142_v6, 4  ;;  %v2149_v10 = vrot.slane %v2143_v7, 4 }
 0x58f   :  { %2145 = vst [vmem:[%s2847_s8 + $0x8] sm:$0xf] %v2141_v5 }
 0x590   :  { %2152 = vst [vmem:[%s2847_s8] sm:$0xf0] %v2148_v9 }
 0x591   :  { %2153 = vst [vmem:[%s2847_s8 + $0x8] sm:$0xf0] %v2149_v10 }

</bundles_post_ra>
